<compile_context>
chip_gen: v5e
topology: v5e:2x2
jax: 0.10.0
libtpu: 0.0.40
codegen_flags: <defaults>
</compile_context>

<pallas_src>
import functools

import jax
import jax.numpy as jnp
from jax.experimental import pallas as pl
from jax.experimental.pallas import tpu as pltpu

EPS = 1e-5


# ----------------------------------------------------------------------------
# Fused kernel
# ----------------------------------------------------------------------------
def _bn_train(h, gamma, beta, inv_n):
    """Training-mode BatchNorm1d over the agent axis, one-pass form.

    var = E[h^2] - E[h]^2 (clamped at 0); gamma*rsqrt(var+eps) folded into a
    single [1, D] scale so the [N, D] tensor is touched only once.
    """
    s1 = jnp.sum(h, axis=0, keepdims=True) * inv_n            # mean   [1, D]
    s2 = jnp.sum(h * h, axis=0, keepdims=True) * inv_n        # E[h^2] [1, D]
    var = jnp.maximum(s2 - s1 * s1, 0.0)
    scale = gamma * jax.lax.rsqrt(var + EPS)                  # [1, D]
    shift = beta - s1 * scale                                 # [1, D]
    return h * scale + shift


def _re_embed_block_kernel(pos_ref, map_ref, local_ref, w1_ref, w2_ref, vec_ref,
                           out_ref, *, H, W):
    N, D = local_ref.shape
    HW = map_ref.shape[1]
    inv_n = 1.0 / N

    # -------- ReEmbed context, fully fused (no XLA scatter / pad / conv / gather)
    # TODO(synk): ReEmbed source was not provided with the module; implemented as
    # scatter-add of (detached) local feats into the global map at the agents'
    # positions followed by a 5-point (center + 4-connected) neighborhood-sum
    # context gather per agent ("perm5"-style context re-embedding).
    pos = pos_ref[...]                                  # [N, 2] int32 (row, col)
    r = pos[:, 0:1]
    c = pos[:, 1:2]
    flat = r * W + c                                    # [N, 1] flat cell id
    up    = jnp.where(r - 1 >= 0, flat - W, -1)         # -1 never matches iota
    down  = jnp.where(r + 1 < H,  flat + W, -1)
    left  = jnp.where(c - 1 >= 0, flat - 1, -1)
    right = jnp.where(c + 1 < W,  flat + 1, -1)

    iota = jax.lax.broadcasted_iota(jnp.int32, (N, HW), 1)     # cell ids on lanes
    S = (iota == flat).astype(jnp.float32)                     # [N, HW] own cell
    G5 = ((iota == flat) | (iota == up) | (iota == down)
          | (iota == left) | (iota == right)).astype(jnp.float32)  # 5-pt stencil

    local = local_ref[...]                              # [N, D]  f32
    mapv = map_ref[...]                                 # [D, HW] f32

    # ctx = G5 @ (global_map + S^T @ local) == G5 @ map^T + (G5 @ S^T) @ local.
    # Gather/scatter matmuls stay f32 (they implement an exact gather/scatter-add).
    contract_last = (((1,), (1,)), ((), ()))            # a @ b.T pattern
    ctx = jax.lax.dot_general(G5, mapv, contract_last,
                              preferred_element_type=jnp.float32)       # [N, D]
    adj = jax.lax.dot_general(G5, S, contract_last,
                              preferred_element_type=jnp.float32)       # [N, N]
    ctx = ctx + jnp.dot(adj, local, preferred_element_type=jnp.float32)

    # -------- proj: Linear -> ReLU -> BN -> Linear -> ReLU -> BN (bf16 MXU ops)
    v = vec_ref[...]                                    # [8, D] packed vectors
    b1, b2 = v[0:1, :], v[1:2, :]
    g1, be1 = v[2:3, :], v[3:4, :]
    g2, be2 = v[4:5, :], v[5:6, :]
    g3, be3 = v[6:7, :], v[7:8, :]

    h = jnp.dot(local.astype(jnp.bfloat16), w1_ref[...],
                preferred_element_type=jnp.float32) + b1
    h = jnp.maximum(h, 0.0)
    h = _bn_train(h, g1, be1, inv_n)
    h = jnp.dot(h.astype(jnp.bfloat16), w2_ref[...],
                preferred_element_type=jnp.float32) + b2
    h = jnp.maximum(h, 0.0)
    h = _bn_train(h, g2, be2, inv_n)

    # -------- residual with re-embedded context, then ln: ReLU -> BN
    y = ctx + h
    y = jnp.maximum(y, 0.0)
    y = _bn_train(y, g3, be3, inv_n)
    out_ref[...] = y.astype(out_ref.dtype)


# ----------------------------------------------------------------------------
# Wrapper (single gridless pallas_call, whole arrays resident in VMEM)
# ----------------------------------------------------------------------------
@jax.jit
def re_embed_block_forward(global_feats, curr_positions, local_feats,
                           w1t_bf16, w2t_bf16, vecs):
    """Forward of ReEmbedBlock. Returns [num_agents, hidden] float32."""
    D, H, W = global_feats.shape
    N, Dl = local_feats.shape
    assert D == Dl
    map_flat = global_feats.reshape(D, H * W)           # contiguous collapse, free

    vspec = pl.BlockSpec(memory_space=pltpu.MemorySpace.VMEM)
    out = pl.pallas_call(
        functools.partial(_re_embed_block_kernel, H=H, W=W),
        out_shape=jax.ShapeDtypeStruct((N, D), jnp.float32),
        in_specs=[vspec] * 6,
        out_specs=vspec,
    )(curr_positions, map_flat, local_feats, w1t_bf16, w2t_bf16, vecs)
    return out


# ----------------------------------------------------------------------------
# Parameters: raw (PyTorch-like) init + one-time kernel-ready packing
# ----------------------------------------------------------------------------
def init_params(key, hidden_dim):
    ks = jax.random.split(key, 8)
    lim = 1.0 / jnp.sqrt(hidden_dim)
    return {
        "w1": jax.random.uniform(ks[0], (hidden_dim, hidden_dim), jnp.float32, -lim, lim),
        "b1": jax.random.uniform(ks[1], (hidden_dim,), jnp.float32, -lim, lim),
        "w2": jax.random.uniform(ks[2], (hidden_dim, hidden_dim), jnp.float32, -lim, lim),
        "b2": jax.random.uniform(ks[3], (hidden_dim,), jnp.float32, -lim, lim),
        "bn1_g": 1.0 + 0.1 * jax.random.normal(ks[4], (hidden_dim,), jnp.float32),
        "bn1_b": 0.1 * jax.random.normal(ks[5], (hidden_dim,), jnp.float32),
        "bn2_g": 1.0 + 0.1 * jax.random.normal(ks[6], (hidden_dim,), jnp.float32),
        "bn2_b": 0.1 * jax.random.normal(ks[7], (hidden_dim,), jnp.float32),
        "bn3_g": jnp.ones((hidden_dim,), jnp.float32),
        "bn3_b": jnp.zeros((hidden_dim,), jnp.float32),
    }


def prepare_params(params):
    """One-time (init-time) packing: pre-transpose Linear weights (PyTorch stores
    [out, in]; kernel does x @ W^T), cast MXU operands to bf16, pack the 8
    per-channel vectors into one [8, D] f32 slab. Nothing is rebuilt per call."""
    vecs = jnp.stack([params["b1"], params["b2"],
                      params["bn1_g"], params["bn1_b"],
                      params["bn2_g"], params["bn2_b"],
                      params["bn3_g"], params["bn3_b"]], axis=0).astype(jnp.float32)
    return {
        "w1t": params["w1"].T.astype(jnp.bfloat16),
        "w2t": params["w2"].T.astype(jnp.bfloat16),
        "vecs": vecs,
    }


# ----------------------------------------------------------------------------
# Pure-JAX reference (mirrors the original PyTorch forward semantics)
# ----------------------------------------------------------------------------
def _reference_forward(global_feats, curr_positions, local_feats, params):
    D, H, W = global_feats.shape
    lf_det = jax.lax.stop_gradient(local_feats)
    flat_idx = curr_positions[:, 0] * W + curr_positions[:, 1]
    m = global_feats.reshape(D, H * W)
    m = m.at[:, flat_idx].add(lf_det.T)
    m = m.reshape(D, H, W)
    p = jnp.pad(m, ((0, 0), (1, 1), (1, 1)))
    nbr = (p[:, 1:-1, 1:-1] + p[:, :-2, 1:-1] + p[:, 2:, 1:-1]
           + p[:, 1:-1, :-2] + p[:, 1:-1, 2:])
    ctx = nbr.reshape(D, H * W)[:, flat_idx].T

    def bn(h, g, b):
        mu = jnp.mean(h, axis=0, keepdims=True)
        var = jnp.mean((h - mu) ** 2, axis=0, keepdims=True)
        return g * (h - mu) * jax.lax.rsqrt(var + EPS) + b

    h = local_feats @ params["w1"].T + params["b1"]
    h = jnp.maximum(h, 0.0)
    h = bn(h, params["bn1_g"], params["bn1_b"])
    h = h @ params["w2"].T + params["b2"]
    h = jnp.maximum(h, 0.0)
    h = bn(h, params["bn2_g"], params["bn2_b"])
    y = ctx + h
    y = jnp.maximum(y, 0.0)
    y = bn(y, params["bn3_g"], params["bn3_b"])
    return y


if __name__ == "__main__":
    key = jax.random.PRNGKey(0)
    k_g, k_p, k_l, k_w = jax.random.split(key, 4)

    num_agents, hidden_dim, H, W = 64, 128, 16, 16

    global_feats = jax.random.normal(k_g, (hidden_dim, H, W), jnp.float32)
    curr_positions = jnp.stack(
        [jax.random.randint(k_p, (num_agents,), 0, H),
         jax.random.randint(jax.random.fold_in(k_p, 1), (num_agents,), 0, W)],
        axis=-1).astype(jnp.int32)
    local_feats = jax.random.normal(k_l, (num_agents, hidden_dim), jnp.float32)

    params = init_params(k_w, hidden_dim)
    prepared = prepare_params(params)       # hoisted out of the per-call hot path

    out = re_embed_block_forward(global_feats, curr_positions, local_feats,
                                 prepared["w1t"], prepared["w2t"], prepared["vecs"])
    jax.block_until_ready(out)

    assert out.shape == (num_agents, hidden_dim)
    assert bool(jnp.all(jnp.isfinite(out)))

    ref = _reference_forward(global_feats, curr_positions, local_feats, params)
    err = float(jnp.max(jnp.abs(out - ref)))
    assert err < 0.15, f"max abs err vs reference: {err}"
    print("KERNEL_OK")
</pallas_src>

<mosaic_0001>
module attributes {stable_mosaic.version = 11 : i64} {
  func.func @_re_embed_block_kernel(%arg0: memref<64x2xi32, #tpu.memory_space<vmem>>, %arg1: memref<128x256xf32, #tpu.memory_space<vmem>>, %arg2: memref<64x128xf32, #tpu.memory_space<vmem>>, %arg3: memref<128x128xbf16, #tpu.memory_space<vmem>>, %arg4: memref<128x128xbf16, #tpu.memory_space<vmem>>, %arg5: memref<8x128xf32, #tpu.memory_space<vmem>>, %arg6: memref<64x128xf32, #tpu.memory_space<vmem>>) attributes {dimension_semantics = [], scalar_prefetch = 0 : i64, scratch_operands = 0 : i64, tpu.core_type = #tpu.core_type<tc>} {
    %c0 = arith.constant 0 : index
    %c0_0 = arith.constant 0 : index
    %0 = vector.load %arg0[%c0, %c0_0] : memref<64x2xi32, #tpu.memory_space<vmem>>, vector<64x2xi32>
    %1 = vector.extract_strided_slice %0 {offsets = [0, 0], sizes = [64, 1], strides = [1, 1]} : vector<64x2xi32> to vector<64x1xi32>
    %2 = vector.extract_strided_slice %0 {offsets = [0, 1], sizes = [64, 1], strides = [1, 1]} : vector<64x2xi32> to vector<64x1xi32>
    %c16_i32 = arith.constant 16 : i32
    %3 = vector.broadcast %c16_i32 : i32 to vector<64x1xi32>
    %4 = arith.muli %1, %3 : vector<64x1xi32>
    %5 = arith.addi %4, %2 : vector<64x1xi32>
    %c1_i32 = arith.constant 1 : i32
    %6 = vector.broadcast %c1_i32 : i32 to vector<64x1xi32>
    %7 = arith.subi %1, %6 : vector<64x1xi32>
    %c0_i32 = arith.constant 0 : i32
    %8 = vector.broadcast %c0_i32 : i32 to vector<64x1xi32>
    %9 = arith.cmpi sge, %7, %8 : vector<64x1xi32>
    %c16_i32_1 = arith.constant 16 : i32
    %10 = vector.broadcast %c16_i32_1 : i32 to vector<64x1xi32>
    %11 = arith.subi %5, %10 : vector<64x1xi32>
    %c-1_i32 = arith.constant -1 : i32
    %12 = vector.broadcast %c-1_i32 : i32 to vector<64x1xi32>
    %13 = arith.select %9, %11, %12 : vector<64x1xi1>, vector<64x1xi32>
    %c1_i32_2 = arith.constant 1 : i32
    %14 = vector.broadcast %c1_i32_2 : i32 to vector<64x1xi32>
    %15 = arith.addi %1, %14 : vector<64x1xi32>
    %c16_i32_3 = arith.constant 16 : i32
    %16 = vector.broadcast %c16_i32_3 : i32 to vector<64x1xi32>
    %17 = arith.cmpi slt, %15, %16 : vector<64x1xi32>
    %c16_i32_4 = arith.constant 16 : i32
    %18 = vector.broadcast %c16_i32_4 : i32 to vector<64x1xi32>
    %19 = arith.addi %5, %18 : vector<64x1xi32>
    %c-1_i32_5 = arith.constant -1 : i32
    %20 = vector.broadcast %c-1_i32_5 : i32 to vector<64x1xi32>
    %21 = arith.select %17, %19, %20 : vector<64x1xi1>, vector<64x1xi32>
    %c1_i32_6 = arith.constant 1 : i32
    %22 = vector.broadcast %c1_i32_6 : i32 to vector<64x1xi32>
    %23 = arith.subi %2, %22 : vector<64x1xi32>
    %c0_i32_7 = arith.constant 0 : i32
    %24 = vector.broadcast %c0_i32_7 : i32 to vector<64x1xi32>
    %25 = arith.cmpi sge, %23, %24 : vector<64x1xi32>
    %c1_i32_8 = arith.constant 1 : i32
    %26 = vector.broadcast %c1_i32_8 : i32 to vector<64x1xi32>
    %27 = arith.subi %5, %26 : vector<64x1xi32>
    %c-1_i32_9 = arith.constant -1 : i32
    %28 = vector.broadcast %c-1_i32_9 : i32 to vector<64x1xi32>
    %29 = arith.select %25, %27, %28 : vector<64x1xi1>, vector<64x1xi32>
    %c1_i32_10 = arith.constant 1 : i32
    %30 = vector.broadcast %c1_i32_10 : i32 to vector<64x1xi32>
    %31 = arith.addi %2, %30 : vector<64x1xi32>
    %c16_i32_11 = arith.constant 16 : i32
    %32 = vector.broadcast %c16_i32_11 : i32 to vector<64x1xi32>
    %33 = arith.cmpi slt, %31, %32 : vector<64x1xi32>
    %c1_i32_12 = arith.constant 1 : i32
    %34 = vector.broadcast %c1_i32_12 : i32 to vector<64x1xi32>
    %35 = arith.addi %5, %34 : vector<64x1xi32>
    %c-1_i32_13 = arith.constant -1 : i32
    %36 = vector.broadcast %c-1_i32_13 : i32 to vector<64x1xi32>
    %37 = arith.select %33, %35, %36 : vector<64x1xi1>, vector<64x1xi32>
    %38 = tpu.iota {dimensions = array<i32: 1>} : vector<64x256xi32>
    %39 = vector.broadcast %5 : vector<64x1xi32> to vector<64x256xi32>
    %40 = arith.cmpi eq, %38, %39 : vector<64x256xi32>
    %41 = arith.extui %40 : vector<64x256xi1> to vector<64x256xi32>
    %42 = arith.sitofp %41 : vector<64x256xi32> to vector<64x256xf32>
    %43 = vector.broadcast %5 : vector<64x1xi32> to vector<64x256xi32>
    %44 = arith.cmpi eq, %38, %43 : vector<64x256xi32>
    %45 = vector.broadcast %13 : vector<64x1xi32> to vector<64x256xi32>
    %46 = arith.cmpi eq, %38, %45 : vector<64x256xi32>
    %47 = arith.ori %44, %46 : vector<64x256xi1>
    %48 = vector.broadcast %21 : vector<64x1xi32> to vector<64x256xi32>
    %49 = arith.cmpi eq, %38, %48 : vector<64x256xi32>
    %50 = arith.ori %47, %49 : vector<64x256xi1>
    %51 = vector.broadcast %29 : vector<64x1xi32> to vector<64x256xi32>
    %52 = arith.cmpi eq, %38, %51 : vector<64x256xi32>
    %53 = arith.ori %50, %52 : vector<64x256xi1>
    %54 = vector.broadcast %37 : vector<64x1xi32> to vector<64x256xi32>
    %55 = arith.cmpi eq, %38, %54 : vector<64x256xi32>
    %56 = arith.ori %53, %55 : vector<64x256xi1>
    %57 = arith.extui %56 : vector<64x256xi1> to vector<64x256xi32>
    %58 = arith.sitofp %57 : vector<64x256xi32> to vector<64x256xf32>
    %c0_14 = arith.constant 0 : index
    %c0_15 = arith.constant 0 : index
    %59 = vector.load %arg2[%c0_14, %c0_15] : memref<64x128xf32, #tpu.memory_space<vmem>>, vector<64x128xf32>
    %c0_16 = arith.constant 0 : index
    %c0_17 = arith.constant 0 : index
    %60 = vector.load %arg1[%c0_16, %c0_17] : memref<128x256xf32, #tpu.memory_space<vmem>>, vector<128x256xf32>
    %cst = arith.constant dense<0.000000e+00> : vector<64x128xf32>
    %61 = tpu.matmul %58, %60, %cst {dimension_numbers = #tpu.dot_dimension_numbers<[1], [1], [0], [0], [0, 0, 1, 0], [], []>} : vector<64x256xf32>, vector<128x256xf32>, vector<64x128xf32> -> vector<64x128xf32>
    %cst_18 = arith.constant dense<0.000000e+00> : vector<64x64xf32>
    %62 = tpu.matmul %58, %42, %cst_18 {dimension_numbers = #tpu.dot_dimension_numbers<[1], [1], [0], [0], [0, 0, 1, 0], [], []>} : vector<64x256xf32>, vector<64x256xf32>, vector<64x64xf32> -> vector<64x64xf32>
    %cst_19 = arith.constant dense<0.000000e+00> : vector<64x128xf32>
    %63 = tpu.matmul %62, %59, %cst_19 {dimension_numbers = #tpu.dot_dimension_numbers<[1], [0], [0], [1], [0, 0, 1, 1], [], []>} : vector<64x64xf32>, vector<64x128xf32>, vector<64x128xf32> -> vector<64x128xf32>
    %64 = arith.addf %61, %63 : vector<64x128xf32>
    %c0_20 = arith.constant 0 : index
    %c0_21 = arith.constant 0 : index
    %65 = vector.load %arg5[%c0_20, %c0_21] : memref<8x128xf32, #tpu.memory_space<vmem>>, vector<8x128xf32>
    %66 = vector.extract_strided_slice %65 {offsets = [0, 0], sizes = [1, 128], strides = [1, 1]} : vector<8x128xf32> to vector<1x128xf32>
    %67 = vector.extract_strided_slice %65 {offsets = [1, 0], sizes = [1, 128], strides = [1, 1]} : vector<8x128xf32> to vector<1x128xf32>
    %68 = vector.extract_strided_slice %65 {offsets = [2, 0], sizes = [1, 128], strides = [1, 1]} : vector<8x128xf32> to vector<1x128xf32>
    %69 = vector.extract_strided_slice %65 {offsets = [3, 0], sizes = [1, 128], strides = [1, 1]} : vector<8x128xf32> to vector<1x128xf32>
    %70 = vector.extract_strided_slice %65 {offsets = [4, 0], sizes = [1, 128], strides = [1, 1]} : vector<8x128xf32> to vector<1x128xf32>
    %71 = vector.extract_strided_slice %65 {offsets = [5, 0], sizes = [1, 128], strides = [1, 1]} : vector<8x128xf32> to vector<1x128xf32>
    %72 = vector.extract_strided_slice %65 {offsets = [6, 0], sizes = [1, 128], strides = [1, 1]} : vector<8x128xf32> to vector<1x128xf32>
    %73 = vector.extract_strided_slice %65 {offsets = [7, 0], sizes = [1, 128], strides = [1, 1]} : vector<8x128xf32> to vector<1x128xf32>
    %74 = arith.truncf %59 : vector<64x128xf32> to vector<64x128xbf16>
    %c0_22 = arith.constant 0 : index
    %c0_23 = arith.constant 0 : index
    %75 = vector.load %arg3[%c0_22, %c0_23] : memref<128x128xbf16, #tpu.memory_space<vmem>>, vector<128x128xbf16>
    %cst_24 = arith.constant dense<0.000000e+00> : vector<64x128xf32>
    %76 = tpu.matmul %74, %75, %cst_24 {dimension_numbers = #tpu.dot_dimension_numbers<[1], [0], [0], [1], [0, 0, 1, 1], [], []>} : vector<64x128xbf16>, vector<128x128xbf16>, vector<64x128xf32> -> vector<64x128xf32>
    %77 = vector.broadcast %66 : vector<1x128xf32> to vector<64x128xf32>
    %78 = arith.addf %76, %77 : vector<64x128xf32>
    %cst_25 = arith.constant 0.000000e+00 : f32
    %79 = vector.broadcast %cst_25 : f32 to vector<64x128xf32>
    %80 = arith.maximumf %78, %79 : vector<64x128xf32>
    %cst_26 = arith.constant dense<0.000000e+00> : vector<128xf32>
    %81 = vector.multi_reduction <add>, %80, %cst_26 [0] : vector<64x128xf32> to vector<128xf32>
    %82 = vector.shape_cast %81 : vector<128xf32> to vector<1x128xf32>
    %cst_27 = arith.constant 1.562500e-02 : f32
    %83 = vector.broadcast %cst_27 : f32 to vector<1x128xf32>
    %84 = arith.mulf %82, %83 : vector<1x128xf32>
    %85 = arith.mulf %80, %80 : vector<64x128xf32>
    %cst_28 = arith.constant dense<0.000000e+00> : vector<128xf32>
    %86 = vector.multi_reduction <add>, %85, %cst_28 [0] : vector<64x128xf32> to vector<128xf32>
    %87 = vector.shape_cast %86 : vector<128xf32> to vector<1x128xf32>
    %cst_29 = arith.constant 1.562500e-02 : f32
    %88 = vector.broadcast %cst_29 : f32 to vector<1x128xf32>
    %89 = arith.mulf %87, %88 : vector<1x128xf32>
    %90 = arith.mulf %84, %84 : vector<1x128xf32>
    %91 = arith.subf %89, %90 : vector<1x128xf32>
    %cst_30 = arith.constant 0.000000e+00 : f32
    %92 = vector.broadcast %cst_30 : f32 to vector<1x128xf32>
    %93 = arith.maximumf %91, %92 : vector<1x128xf32>
    %cst_31 = arith.constant 9.99999974E-6 : f32
    %94 = vector.broadcast %cst_31 : f32 to vector<1x128xf32>
    %95 = arith.addf %93, %94 : vector<1x128xf32>
    %96 = math.rsqrt %95 : vector<1x128xf32>
    %97 = arith.mulf %68, %96 : vector<1x128xf32>
    %98 = arith.mulf %84, %97 : vector<1x128xf32>
    %99 = arith.subf %69, %98 : vector<1x128xf32>
    %100 = vector.broadcast %97 : vector<1x128xf32> to vector<64x128xf32>
    %101 = arith.mulf %80, %100 : vector<64x128xf32>
    %102 = vector.broadcast %99 : vector<1x128xf32> to vector<64x128xf32>
    %103 = arith.addf %101, %102 : vector<64x128xf32>
    %104 = arith.truncf %103 : vector<64x128xf32> to vector<64x128xbf16>
    %c0_32 = arith.constant 0 : index
    %c0_33 = arith.constant 0 : index
    %105 = vector.load %arg4[%c0_32, %c0_33] : memref<128x128xbf16, #tpu.memory_space<vmem>>, vector<128x128xbf16>
    %cst_34 = arith.constant dense<0.000000e+00> : vector<64x128xf32>
    %106 = tpu.matmul %104, %105, %cst_34 {dimension_numbers = #tpu.dot_dimension_numbers<[1], [0], [0], [1], [0, 0, 1, 1], [], []>} : vector<64x128xbf16>, vector<128x128xbf16>, vector<64x128xf32> -> vector<64x128xf32>
    %107 = vector.broadcast %67 : vector<1x128xf32> to vector<64x128xf32>
    %108 = arith.addf %106, %107 : vector<64x128xf32>
    %cst_35 = arith.constant 0.000000e+00 : f32
    %109 = vector.broadcast %cst_35 : f32 to vector<64x128xf32>
    %110 = arith.maximumf %108, %109 : vector<64x128xf32>
    %cst_36 = arith.constant dense<0.000000e+00> : vector<128xf32>
    %111 = vector.multi_reduction <add>, %110, %cst_36 [0] : vector<64x128xf32> to vector<128xf32>
    %112 = vector.shape_cast %111 : vector<128xf32> to vector<1x128xf32>
    %cst_37 = arith.constant 1.562500e-02 : f32
    %113 = vector.broadcast %cst_37 : f32 to vector<1x128xf32>
    %114 = arith.mulf %112, %113 : vector<1x128xf32>
    %115 = arith.mulf %110, %110 : vector<64x128xf32>
    %cst_38 = arith.constant dense<0.000000e+00> : vector<128xf32>
    %116 = vector.multi_reduction <add>, %115, %cst_38 [0] : vector<64x128xf32> to vector<128xf32>
    %117 = vector.shape_cast %116 : vector<128xf32> to vector<1x128xf32>
    %cst_39 = arith.constant 1.562500e-02 : f32
    %118 = vector.broadcast %cst_39 : f32 to vector<1x128xf32>
    %119 = arith.mulf %117, %118 : vector<1x128xf32>
    %120 = arith.mulf %114, %114 : vector<1x128xf32>
    %121 = arith.subf %119, %120 : vector<1x128xf32>
    %cst_40 = arith.constant 0.000000e+00 : f32
    %122 = vector.broadcast %cst_40 : f32 to vector<1x128xf32>
    %123 = arith.maximumf %121, %122 : vector<1x128xf32>
    %cst_41 = arith.constant 9.99999974E-6 : f32
    %124 = vector.broadcast %cst_41 : f32 to vector<1x128xf32>
    %125 = arith.addf %123, %124 : vector<1x128xf32>
    %126 = math.rsqrt %125 : vector<1x128xf32>
    %127 = arith.mulf %70, %126 : vector<1x128xf32>
    %128 = arith.mulf %114, %127 : vector<1x128xf32>
    %129 = arith.subf %71, %128 : vector<1x128xf32>
    %130 = vector.broadcast %127 : vector<1x128xf32> to vector<64x128xf32>
    %131 = arith.mulf %110, %130 : vector<64x128xf32>
    %132 = vector.broadcast %129 : vector<1x128xf32> to vector<64x128xf32>
    %133 = arith.addf %131, %132 : vector<64x128xf32>
    %134 = arith.addf %64, %133 : vector<64x128xf32>
    %cst_42 = arith.constant 0.000000e+00 : f32
    %135 = vector.broadcast %cst_42 : f32 to vector<64x128xf32>
    %136 = arith.maximumf %134, %135 : vector<64x128xf32>
    %cst_43 = arith.constant dense<0.000000e+00> : vector<128xf32>
    %137 = vector.multi_reduction <add>, %136, %cst_43 [0] : vector<64x128xf32> to vector<128xf32>
    %138 = vector.shape_cast %137 : vector<128xf32> to vector<1x128xf32>
    %cst_44 = arith.constant 1.562500e-02 : f32
    %139 = vector.broadcast %cst_44 : f32 to vector<1x128xf32>
    %140 = arith.mulf %138, %139 : vector<1x128xf32>
    %141 = arith.mulf %136, %136 : vector<64x128xf32>
    %cst_45 = arith.constant dense<0.000000e+00> : vector<128xf32>
    %142 = vector.multi_reduction <add>, %141, %cst_45 [0] : vector<64x128xf32> to vector<128xf32>
    %143 = vector.shape_cast %142 : vector<128xf32> to vector<1x128xf32>
    %cst_46 = arith.constant 1.562500e-02 : f32
    %144 = vector.broadcast %cst_46 : f32 to vector<1x128xf32>
    %145 = arith.mulf %143, %144 : vector<1x128xf32>
    %146 = arith.mulf %140, %140 : vector<1x128xf32>
    %147 = arith.subf %145, %146 : vector<1x128xf32>
    %cst_47 = arith.constant 0.000000e+00 : f32
    %148 = vector.broadcast %cst_47 : f32 to vector<1x128xf32>
    %149 = arith.maximumf %147, %148 : vector<1x128xf32>
    %cst_48 = arith.constant 9.99999974E-6 : f32
    %150 = vector.broadcast %cst_48 : f32 to vector<1x128xf32>
    %151 = arith.addf %149, %150 : vector<1x128xf32>
    %152 = math.rsqrt %151 : vector<1x128xf32>
    %153 = arith.mulf %72, %152 : vector<1x128xf32>
    %154 = arith.mulf %140, %153 : vector<1x128xf32>
    %155 = arith.subf %73, %154 : vector<1x128xf32>
    %156 = vector.broadcast %153 : vector<1x128xf32> to vector<64x128xf32>
    %157 = arith.mulf %136, %156 : vector<64x128xf32>
    %158 = vector.broadcast %155 : vector<1x128xf32> to vector<64x128xf32>
    %159 = arith.addf %157, %158 : vector<64x128xf32>
    %c0_49 = arith.constant 0 : index
    %c0_50 = arith.constant 0 : index
    %160 = vector.load %arg6[%c0_49, %c0_50] : memref<64x128xf32, #tpu.memory_space<vmem>>, vector<64x128xf32>
    tpu.vector_store %arg6[%c0_49, %c0_50], %159 {strides = array<i32>} : memref<64x128xf32, #tpu.memory_space<vmem>>, vector<64x128xf32>,
    return
  }
}

</mosaic_0001>

<bundles_post_ra>
// kernel: re_embed_block_forward.1
= control target key start
LH: loop header
LB: loop body
LE: loop exit
PB: predicated region body
PF: predicated region fallthrough
CT: control target
= control target key end

     0   :  { %s1490_s25 = smov 127   ;;  %s2390_s0 = inlined_call_operand.vmem [shape: s32[64,2], index: 0, kind: input, shape index: {}]   ;;  %s2391_s1 = inlined_call_operand.vmem [shape: f32[128,256], index: 1, kind: input, shape index: {}]   ;;  %s2392_s2 = inlined_call_operand.vmem [shape: f32[64,128], index: 2, kind: input, shape index: {}]   ;;  %s2393_s3 = inlined_call_operand.vmem [shape: bf16[128,128], index: 3, kind: input, shape index: {}]   ;;  %s2394_s4 = inlined_call_operand.vmem [shape: bf16[128,128], index: 4, kind: input, shape index: {}]   ;;  %s2395_s5 = inlined_call_operand.vmem [shape: f32[8,128], index: 5, kind: input, shape index: {}]   ;;  %s2396_s6 = inlined_call_operand.hbm [shape: f32[64,128], index: 6, kind: output, shape index: {}]  }
   0x1   :  { %v1537_v0 = vld [vmem:[%s2390_s0 + $0x38] sm:$0xff]  ;;  %v1542_v1 = vld [vmem:[%s2390_s0] sm:$0xff]  ;;  %v1549_v2 = vld [vmem:[%s2390_s0 + $0x30] sm:$0xff] }
   0x2   :  { %54 = vrot.lane.b32.xlu1 %v1537_v0, %s1490_s25  ;;  %40 = vrot.lane.b32.xlu0 %v1542_v1, %s1490_s25 }
   0x3   :  { %52 = vrot.lane.b32.xlu2 %v1549_v2, %s1490_s25 }
   0x4   :  { %11 = vsyncpa [#allocation3], 0  ;;  %v1555_v3 = vld [vmem:[%s2390_s0 + $0x10] sm:$0xff]  ;;  %v1560_v4 = vld [vmem:[%s2390_s0 + $0x8] sm:$0xff]  ;;  %v1491_v8 = vmov 0   ;;  %v38_v9 = vmul.u32 16, %v1549_v2 }
   0x5   :  { %v1565_v5 = vld [vmem:[%s2390_s0 + $0x28] sm:$0xff]  ;;  %v1573_v6 = vld [vmem:[%s2390_s0 + $0x20] sm:$0xff]  ;;  %v1578_v7 = vld [vmem:[%s2390_s0 + $0x18] sm:$0xff]  ;;  %1440 = vset.pattern.permute.xlu2 %v1491_v8  ;;  %1439 = vset.pattern.permute.xlu0 %v1491_v8  ;;  %v39_v15 = vmul.u32 16, %v1537_v0  ;;  %v34_v19 = vmul.u32 16, %v1555_v3  ;;  %v32_v23 = vmul.u32 16, %v1542_v1 }
   0x6   :  { %1441 = vset.pattern.permute.xlu1 %v1491_v8  ;;  %v37_v12 = vmul.u32 16, %v1565_v5  ;;  %v36_v24 = vmul.u32 16, %v1573_v6  ;;  %v35_v25 = vmul.u32 16, %v1578_v7  ;;  %v33_v31 = vmul.u32 16, %v1560_v4  ;;  %s1492_s0 = smov 1   ;;  %s1258_s24 = sshll.u32 %s2396_s6, 4  ;;  %s1259_s24 = int_to_ptr.hbm [resolvable:$true] %s1258_s24 }
   0x7   :  { %v1270_v47 = vadd.s32 4294967295, %v1542_v1  ;;  %v1641_v52 = vadd.s32 1, %v1542_v1  ;;  %v97_v53 = vadd.s32 1, %v1560_v4  ;;  %v1650_v58 = vadd.s32 4294967295, %v1560_v4  ;;  %s1498_s26 = smov 8  }
   0x8   :  { %v1653_v59 = vadd.s32 1, %v1555_v3 }
   0x9   :  { %vm72_vm0 = vcmp.ge.s32.totalorder %v1270_v47, 0  ;;  %vm104_vm1 = vcmp.lt.s32.totalorder %v1641_v52, 16  ;;  %vm105_vm2 = vcmp.lt.s32.totalorder %v97_v53, 16  ;;  %vm73_vm3 = vcmp.ge.s32.totalorder %v1650_v58, 0  ;;  %v547_v58 = vld [vmem:[%s2391_s1 + $0x80] sm:$0xff] }
   0xa   :  { %44 = vrot.lane.b32.xlu1 %v1555_v3, %s1490_s25  ;;  %42 = vrot.lane.b32.xlu0 %v1560_v4, %s1490_s25  ;;  %vm106_vm4 = vcmp.lt.s32.totalorder %v1653_v59, 16  ;;  %v1665_v4 = vadd.s32 4294967295, %v1555_v3  ;;  %v100_v59 = vadd.s32 1, %v1573_v6 }
   0xb   :  { %50 = vrot.lane.b32.xlu2 %v1565_v5, %s1490_s25 }
   0xc   :  { %vm74_vm5 = vcmp.ge.s32.totalorder %v1665_v4, 0 }
  0x12   :  { %48 = vrot.lane.b32.xlu1 %v1573_v6, %s1490_s25  ;;  %46 = vrot.lane.b32.xlu0 %v1578_v7, %s1490_s25  ;;  %s1497_s25 = smov 128  }
  0x5d   :  { %v53_v10 = vpop.permute.xlu2 %52 }
  0x5e   :  { %v1586_v11 = vadd.s32 %v53_v10, %v38_v9  ;;  %v1493_v10 = vmov 1  }
  0x60   :  { %214 = vperm.xlu2 %1440, %v1586_v11   ;;  %v1292_v42 = vadd.s32 4294967295, %v1586_v11  ;;  %v166_v46 = vadd.s32 1, %v1586_v11 }
  0x65   :  { %v51_v13 = vpop.permute.xlu2 %50 }
  0x66   :  { %v1590_v14 = vadd.s32 %v51_v13, %v37_v12 }
  0x68   :  { %211 = vperm.xlu2 %1440, %v1590_v14   ;;  %v1291_v43 = vadd.s32 4294967295, %v1590_v14  ;;  %v165_v49 = vadd.s32 1, %v1590_v14  ;;  %v117_v53 = vadd.s32 16, %v1590_v14 }
  0x74   :  { %v55_v16 = vpop.permute.xlu1 %54  ;;  %v41_v17 = vpop.permute.xlu0 %40 }
  0x75   :  { %v1594_v18 = vadd.s32 %v55_v16, %v39_v15  ;;  %v56_v26 = vadd.s32 %v41_v17, %v32_v23  ;;  %v1675_v15 = vadd.s32 4294967295, %v1578_v7 }
  0x77   :  { %217 = vperm.xlu0 %1439, %v1594_v18   ;;  %v160_v33 = vadd.s32 1, %v56_v26  ;;  %v1286_v34 = vadd.s32 4294967295, %v56_v26  ;;  %v1293_v45 = vadd.s32 4294967295, %v1594_v18  ;;  %v1278_v48 = vadd.s32 4294967280, %v56_v26 }
  0x78   :  { %v167_v50 = vadd.s32 1, %v1594_v18  ;;  %v112_v54 = vadd.s32 16, %v56_v26  ;;  %vm75_vm6 = vcmp.ge.s32.totalorder %v1675_v15, 0  ;;  %v543_v15 = vld [vmem:[%s2391_s1 + $0x60] sm:$0xff] }
  0x79   :  { %v88_v51 = vsel %vm72_vm0, %v1278_v48, 4294967295  ;;  %v553_v48 = vld [vmem:[%s2391_s1 + $0xb0] sm:$0xff] }
  0x7a   :  { %v120_v56 = vsel %vm104_vm1, %v112_v54, 4294967295  ;;  %v1283_v54 = vadd.s32 4294967280, %v1590_v14  ;;  %v549_v14 = vld [vmem:[%s2391_s1 + $0x90] sm:$0xff] }
  0x7c   :  { %v45_v20 = vpop.permute.xlu1 %44  ;;  %v43_v21 = vpop.permute.xlu0 %42 }
  0x7d   :  { %v1598_v22 = vadd.s32 %v45_v20, %v34_v19  ;;  %v57_v32 = vadd.s32 %v43_v21, %v33_v31  ;;  %v192_v19 = vlaneseq }
  0x7f   :  { %202 = vperm.xlu2 %1440, %v1598_v22   ;;  %v1287_v36 = vadd.s32 4294967295, %v57_v32  ;;  %v161_v37 = vadd.s32 1, %v57_v32  ;;  %v1288_v39 = vadd.s32 4294967295, %v1598_v22  ;;  %v162_v41 = vadd.s32 1, %v1598_v22 }
  0x80   :  { %v113_v55 = vadd.s32 16, %v57_v32  ;;  %v1279_v60 = vadd.s32 4294967280, %v57_v32  ;;  %v114_v61 = vadd.s32 16, %v1598_v22  ;;  %v1280_v9 = vadd.s32 4294967280, %v1598_v22 }
  0x81   :  { %v1687_v21 = vand.u32 127, %v192_v19 }
  0x82   :  { %v121_v57 = vsel %vm105_vm2, %v113_v55, 4294967295  ;;  %v89_v63 = vsel %vm73_vm3, %v1279_v60, 4294967295  ;;  %v122_v1 = vsel %vm106_vm4, %v114_v61, 4294967295  ;;  %v90_v12 = vsel %vm74_vm5, %v1280_v9, 4294967295 }
  0x83   :  { %v1690_v22 = vadd.s32 128, %v1687_v21 }
  0x84   :  { %v49_v27 = vpop.permute.xlu1 %48  ;;  %v47_v28 = vpop.permute.xlu0 %46 }
  0x85   :  { %v1604_v29 = vadd.s32 %v49_v27, %v36_v24  ;;  %v1606_v30 = vadd.s32 %v47_v28, %v35_v25 }
  0x87   :  { %208 = vperm.xlu1 %1441, %v1604_v29   ;;  %205 = vperm.xlu0 %1439, %v1606_v30   ;;  %v1289_v35 = vadd.s32 4294967295, %v1606_v30  ;;  %v163_v38 = vadd.s32 1, %v1606_v30  ;;  %v164_v40 = vadd.s32 1, %v1604_v29  ;;  %v1290_v44 = vadd.s32 4294967295, %v1604_v29 }
  0x88   :  { %196 = vperm.xlu2 %1440, %v56_v26   ;;  %v1281_v3 = vadd.s32 4294967280, %v1606_v30  ;;  %v1494_v26 = vmov 1.0  }
  0x8a   :  { %v91_v16 = vsel %vm75_vm6, %v1281_v3, 4294967295 }
  0x8f   :  { %199 = vperm.xlu1 %1441, %v57_v32   ;;  %168 = vrot.lane.b32.xlu0 %v160_v33, %s1492_s0 }
  0x90   :  { %136 = vrot.lane.b32.xlu2 %v1286_v34, %s1492_s0 }
  0x97   :  { %138 = vrot.lane.b32.xlu1 %v1287_v36, %s1492_s0  ;;  %142 = vrot.lane.b32.xlu0 %v1289_v35, %s1492_s0  ;;  %v561_v36 = vld [vmem:[%s2391_s1 + $0xf0] sm:$0xff] }
  0x98   :  { %170 = vrot.lane.b32.xlu2 %v161_v37, %s1492_s0  ;;  %711 = vmatpush.xpose.msra.mxu3 %v561_v36  ;;  %v99_v37 = vadd.s32 1, %v1578_v7  ;;  %v115_v7 = vadd.s32 16, %v1606_v30 }
  0x9f   :  { %140 = vrot.lane.b32.xlu1 %v1288_v39, %s1492_s0  ;;  %176 = vrot.lane.b32.xlu0 %v164_v40, %s1492_s0 }
  0xa0   :  { %174 = vrot.lane.b32.xlu2 %v163_v38, %s1492_s0  ;;  %v559_v38 = vld [vmem:[%s2391_s1 + $0xe0] sm:$0xff] }
  0xa1   :  { %712 = vmatpush.xpose.msra.mxu3 %v559_v38 }
  0xa7   :  { %172 = vrot.lane.b32.xlu1 %v162_v41, %s1492_s0  ;;  %148 = vrot.lane.b32.xlu0 %v1292_v42, %s1492_s0  ;;  %v557_v41 = vld [vmem:[%s2391_s1 + $0xd0] sm:$0xff]  ;;  %v1274_v42 = vadd.s32 4294967295, %v1573_v6  ;;  %v1276_v6 = vadd.s32 4294967295, %v1549_v2 }
  0xa8   :  { %146 = vrot.lane.b32.xlu2 %v1291_v43, %s1492_s0  ;;  %713 = vmatpush.xpose.msra.mxu3 %v557_v41  ;;  %v555_v43 = vld [vmem:[%s2391_s1 + $0xc0] sm:$0xff]  ;;  %v119_v41 = vadd.s32 16, %v1594_v18 }
  0xac   :  { %714 = vmatpush.xpose.msra.mxu3 %v555_v43  ;;  %v1277_v43 = vadd.s32 4294967295, %v1537_v0 }
  0xaf   :  { %144 = vrot.lane.b32.xlu1 %v1290_v44, %s1492_s0  ;;  %150 = vrot.lane.b32.xlu0 %v1293_v45, %s1492_s0  ;;  %v1282_v44 = vadd.s32 4294967280, %v1604_v29 }
  0xb0   :  { %180 = vrot.lane.b32.xlu2 %v166_v46, %s1492_s0  ;;  %715 = vmatpush.xpose.msra.mxu3 %v553_v48  ;;  %v531_v48 = vld [vmem:[%s2391_s1] sm:$0xff] }
  0xb7   :  { %178 = vrot.lane.b32.xlu1 %v165_v49, %s1492_s0  ;;  %268 = vperm.xlu0 %1439, %v88_v51   ;;  %v1275_v49 = vadd.s32 4294967295, %v1565_v5  ;;  %v551_v51 = vld [vmem:[%s2391_s1 + $0xa0] sm:$0xff] }
  0xb8   :  { %182 = vrot.lane.b32.xlu2 %v167_v50, %s1492_s0  ;;  %v1812_v50 = vadd.s32 1, %v1565_v5  ;;  %716 = vmatpush.xpose.msra.mxu3 %v551_v51 }
  0xba   :  { %v1658_v62 = vpop.permute.xlu2 %214 }
  0xbb   :  { %vm2402_vm9 = vcmp.eq.s32.totalorder %v1687_v21, %v1658_v62  ;;  %vm2399_vm10 = vcmp.eq.s32.totalorder %v1690_v22, %v1658_v62 }
  0xbc   :  { %717 = vmatpush.xpose.msra.mxu3 %v549_v14  ;;  %v1421_v14 = vld [vmem:[%s2393_s3 + $0x38] sm:$0xff] }
  0xbf   :  { %324 = vperm.xlu1 %1441, %v120_v56   ;;  %1442 = vset.pattern.permute.xlu0 %v1493_v10 }
  0xc0   :  { %327 = vperm.xlu2 %1440, %v121_v57   ;;  %718 = vmatpush.xpose.msra.mxu3 %v547_v58 }
  0xc2   :  { %v1672_v13 = vpop.permute.xlu2 %211 }
  0xc3   :  { %vm2401_vm11 = vcmp.eq.s32.totalorder %v1687_v21, %v1672_v13  ;;  %vm2400_vm12 = vcmp.eq.s32.totalorder %v1690_v22, %v1672_v13 }
  0xc7   :  { %271 = vperm.xlu1 %1441, %v89_v63  }
  0xc8   :  { %330 = vperm.xlu2 %1440, %v122_v1   ;;  %v545_v1 = vld [vmem:[%s2391_s1 + $0x70] sm:$0xff] }
  0xc9   :  { %719 = vmatpush.xpose.msra.mxu3 %v545_v1 }
  0xcd   :  { %720 = vmatpush.xpose.msra.mxu3 %v543_v15  ;;  %v1417_v15 = vld [vmem:[%s2393_s3 + $0x18] sm:$0xff] }
  0xcf   :  { %274 = vperm.xlu1 %1441, %v90_v12   ;;  %v116_v12 = vadd.s32 16, %v1604_v29 }
  0xd0   :  { %1443 = vset.pattern.permute.xlu2 %v1493_v10 }
  0xd7   :  { %277 = vperm.xlu1 %1441, %v91_v16   ;;  %v1284_v16 = vadd.s32 4294967280, %v1586_v11 }
  0xd9   :  { %v1682_v17 = vpop.permute.xlu2 %202 }
  0xdf   :  { %1445 = vset.pattern.permute.xlu1 %v1493_v10 }
  0xe2   :  { %v1685_v20 = vpop.permute.xlu2 %196 }
  0xe9   :  { %v1692_v23 = vpop.permute.xlu0 %217 }
  0xea   :  { %v137_v24 = vpop.permute.xlu2 %136  ;;  %vm2398_vm7 = vcmp.eq.s32.totalorder %v1687_v21, %v1692_v23  ;;  %vm2397_vm8 = vcmp.eq.s32.totalorder %v1690_v22, %v1692_v23 }
  0xeb   :  { %v152_v25 = vsel %vm72_vm0, %v137_v24, 4294967295  ;;  %1326 = vmatpush.xpose.msk.msra.mxu0 %vm2398_vm7, %v1494_v26  ;;  %1334 = vmatpush.xpose.msk.msra.mxu1 %vm2397_vm8, %v1494_v26  ;;  %vm2407_vm8 = vcmp.eq.s32.totalorder %v1690_v22, %v1682_v17  ;;  %v541_v24 = vld [vmem:[%s2391_s1 + $0x50] sm:$0xff] }
  0xec   :  { %380 = vperm.xlu0 %1442, %v152_v25   ;;  %721 = vmatpush.xpose.msra.mxu3 %v541_v24 }
  0xef   :  { %1327 = vmatpush.xpose.msk.msra.mxu0 %vm2402_vm9, %v1494_v26  ;;  %1335 = vmatpush.xpose.msk.msra.mxu1 %vm2399_vm10, %v1494_v26  ;;  %vm107_vm10 = vcmp.lt.s32.totalorder %v99_v37, 16  ;;  %vm109_vm9 = vcmp.lt.s32.totalorder %v1812_v50, 16 }
  0xf0   :  { %v123_v30 = vsel %vm107_vm10, %v115_v7, 4294967295  ;;  %v125_v5 = vsel %vm109_vm9, %v117_v53, 4294967295  ;;  %v103_v7 = vadd.s32 1, %v1537_v0 }
  0xf2   :  { %v171_v27 = vpop.permute.xlu2 %170 }
  0xf3   :  { %v185_v28 = vsel %vm105_vm2, %v171_v27, 4294967295  ;;  %1328 = vmatpush.xpose.msk.msra.mxu0 %vm2401_vm11, %v1494_v26  ;;  %1336 = vmatpush.xpose.msk.msra.mxu1 %vm2400_vm12, %v1494_v26  ;;  %vm2408_vm2 = vcmp.eq.s32.totalorder %v1687_v21, %v1682_v17  ;;  %vm219_vm12 = vcmp.eq.s32.totalorder %v1687_v21, %v1685_v20  ;;  %vm220_vm11 = vcmp.eq.s32.totalorder %v1690_v22, %v1685_v20 }
  0xf4   :  { %439 = vperm.xlu0 %1442, %v185_v28   ;;  %v102_v27 = vadd.s32 1, %v1549_v2  ;;  %v539_v28 = vld [vmem:[%s2391_s1 + $0x40] sm:$0xff]  ;;  %v537_v2 = vld [vmem:[%s2391_s1 + $0x30] sm:$0xff] }
  0xf5   :  { %722 = vmatpush.xpose.msra.mxu3 %v539_v28 }
  0xf9   :  { %v1726_v31 = vpop.permute.xlu1 %208  ;;  %v1728_v32 = vpop.permute.xlu0 %205  ;;  %723 = vmatpush.xpose.msra.mxu3 %v537_v2 }
  0xfa   :  { %vm2404_vm13 = vcmp.eq.s32.totalorder %v1687_v21, %v1726_v31  ;;  %vm2403_vm14 = vcmp.eq.s32.totalorder %v1690_v22, %v1726_v31  ;;  %vm2406_vm15 = vcmp.eq.s32.totalorder %v1687_v21, %v1728_v32  ;;  %vm2405_vm0 = vcmp.eq.s32.totalorder %v1690_v22, %v1728_v32  ;;  %v175_v63 = vpop.permute.xlu2 %174 }
  0xfb   :  { %1329 = vmatpush.xpose.msk.msra.mxu0 %vm2404_vm13, %v1494_v26  ;;  %1337 = vmatpush.xpose.msk.msra.mxu1 %vm2403_vm14, %v1494_v26  ;;  %v187_v4 = vsel %vm107_vm10, %v175_v63, 4294967295  ;;  %vm110_vm10 = vcmp.lt.s32.totalorder %v102_v27, 16 }
  0xff   :  { %1330 = vmatpush.xpose.msk.msra.mxu0 %vm2406_vm15, %v1494_v26  ;;  %1338 = vmatpush.xpose.msk.msra.mxu1 %vm2405_vm0, %v1494_v26 }
 0x101   :  { %v1750_v33 = vpop.permute.xlu1 %199  ;;  %v169_v34 = vpop.permute.xlu0 %168 }
 0x102   :  { %v184_v35 = vsel %vm104_vm1, %v169_v34, 4294967295  ;;  %vm221_vm1 = vcmp.eq.s32.totalorder %v1687_v21, %v1750_v33  ;;  %vm2409_vm7 = vcmp.eq.s32.totalorder %v1690_v22, %v1750_v33  ;;  %v147_v25 = vpop.permute.xlu2 %146  ;;  %v118_v34 = vadd.s32 16, %v1586_v11 }
 0x103   :  { %1331 = vmatpush.xpose.msk.msra.mxu0 %vm2408_vm2, %v1494_v26  ;;  %1339 = vmatpush.xpose.msk.msra.mxu1 %vm2407_vm8, %v1494_v26 }
 0x104   :  { %436 = vperm.xlu2 %1443, %v184_v35   ;;  %v126_v37 = vsel %vm110_vm10, %v118_v34, 4294967295 }
 0x107   :  { %1332 = vmatpush.xpose.msk.msra.mxu0 %vm221_vm1, %v1494_v26  ;;  %1340 = vmatpush.xpose.msk.msra.mxu1 %vm2409_vm7, %v1494_v26 }
 0x109   :  { %v139_v39 = vpop.permute.xlu1 %138  ;;  %v143_v52 = vpop.permute.xlu0 %142 }
 0x10a   :  { %v153_v40 = vsel %vm73_vm3, %v139_v39, 4294967295  ;;  %vm76_vm3 = vcmp.ge.s32.totalorder %v1274_v42, 0  ;;  %v155_v60 = vsel %vm75_vm6, %v143_v52, 4294967295  ;;  %vm78_vm6 = vcmp.ge.s32.totalorder %v1276_v6, 0  ;;  %v181_v11 = vpop.permute.xlu2 %180  ;;  %v535_v39 = vld [vmem:[%s2391_s1 + $0x20] sm:$0xff]  ;;  %v533_v42 = vld [vmem:[%s2391_s1 + $0x10] sm:$0xff] }
 0x10b   :  { %1333 = vmatpush.xpose.msk.msra.mxu0 %vm219_vm12, %v1494_v26  ;;  %1341 = vmatpush.xpose.msk.msra.mxu1 %vm220_vm11, %v1494_v26  ;;  %v92_v47 = vsel %vm76_vm3, %v1282_v44, 4294967295  ;;  %v94_v26 = vsel %vm78_vm6, %v1284_v16, 4294967295 }
 0x10c   :  { %1444 = vset.pattern.permute.xlu2 %v1491_v8  ;;  %383 = vperm.xlu1 %1445, %v153_v40   ;;  %v190_v40 = vsel %vm110_vm10, %v181_v11, 4294967295  ;;  %v1414_v11 = vld [vmem:[%s2393_s3] sm:$0xff] }
 0x10d   :  { %333 = vperm.xlu2 %1444, %v123_v30   ;;  %724 = vmatpush.xpose.msra.mxu3 %v535_v39 }
 0x10f   :  { %863 = vmatpush.bf16.msrb.mxu0 %v1421_v14 }
 0x111   :  { %v141_v45 = vpop.permute.xlu1 %140  ;;  %v177_v61 = vpop.permute.xlu0 %176  ;;  %725 = vmatpush.xpose.msra.mxu3 %v533_v42 }
 0x112   :  { %v154_v46 = vsel %vm74_vm5, %v141_v45, 4294967295  ;;  %vm77_vm5 = vcmp.ge.s32.totalorder %v1275_v49, 0  ;;  %v1285_v49 = vadd.s32 4294967280, %v1594_v18 }
 0x113   :  { %v93_v57 = vsel %vm77_vm5, %v1283_v54, 4294967295  ;;  %v157_v35 = vsel %vm77_vm5, %v147_v25, 4294967295  ;;  %vm79_vm5 = vcmp.ge.s32.totalorder %v1277_v43, 0  ;;  %v1416_v25 = vld [vmem:[%s2393_s3 + $0x10] sm:$0xff] }
 0x114   :  { %386 = vperm.xlu1 %1445, %v154_v46   ;;  %v95_v50 = vsel %vm79_vm5, %v1285_v49, 4294967295 }
 0x115   :  { %280 = vperm.xlu2 %1444, %v92_v47   ;;  %v183_v47 = vpop.permute.xlu2 %182  ;;  %726 = vmatpush.xpose.msra.mxu3 %v531_v48  ;;  %v526_v48 = vld [vmem:[%s2392_s2 + $0x18] sm:$0xff] }
 0x119   :  { %v173_v55 = vpop.permute.xlu1 %172  ;;  %v149_v36 = vpop.permute.xlu0 %148 }
 0x11a   :  { %v186_v56 = vsel %vm106_vm4, %v173_v55, 4294967295  ;;  %vm108_vm4 = vcmp.lt.s32.totalorder %v100_v59, 16  ;;  %v158_v38 = vsel %vm78_vm6, %v149_v36, 4294967295  ;;  %v1420_v59 = vld [vmem:[%s2393_s3 + $0x30] sm:$0xff] }
 0x11b   :  { %442 = vperm.xlu0 %1442, %v186_v56   ;;  %v188_v9 = vsel %vm108_vm4, %v177_v61, 4294967295  ;;  %v124_v19 = vsel %vm108_vm4, %v116_v12, 4294967295  ;;  %v1495_v56 = vmov 0.0   ;;  %864 = vmatpush.bf16.msrb.mxu0 %v1420_v59  ;;  %v1418_v12 = vld [vmem:[%s2393_s3 + $0x20] sm:$0xff]  ;;  %v560_v59 = vld [vmem:[%s2391_s1 + $0xe8] sm:$0xff] }
 0x11c   :  { %1447 = vset.pattern.permute.xlu1 %v1491_v8 }
 0x11d   :  { %339 = vperm.xlu2 %1444, %v125_v5   ;;  %283 = vperm.xlu1 %1447, %v93_v57   ;;  %v328_v51 = vpop.permute.xlu2 %327 }
 0x121   :  { %v145_v3 = vpop.permute.xlu1 %144  ;;  %v151_v46 = vpop.permute.xlu0 %150 }
 0x122   :  { %v156_v29 = vsel %vm76_vm3, %v145_v3, 4294967295  ;;  %vm111_vm3 = vcmp.lt.s32.totalorder %v103_v7, 16  ;;  %v159_v0 = vsel %vm79_vm5, %v151_v46, 4294967295 }
 0x123   :  { %389 = vperm.xlu0 %1442, %v155_v60   ;;  %v127_v45 = vsel %vm111_vm3, %v119_v41, 4294967295  ;;  %v191_v52 = vsel %vm111_vm3, %v183_v47, 4294967295  ;;  %v2070_v41 = vld [vmem:[%s2392_s2 + $0x28] sm:$0xff] }
 0x125   :  { %1449 = vset.pattern.permute.xlu2 %v1493_v10  ;;  %1448 = vset.pattern.permute.xlu1 %v1493_v10  ;;  %v1892_v53 = vpop.permute.xlu2 %330 }
 0x126   :  { %448 = vperm.xlu2 %1449, %v188_v9   ;;  %445 = vperm.xlu1 %1448, %v187_v4  }
 0x129   :  { %v179_v30 = vpop.permute.xlu1 %178  ;;  %v269_v54 = vpop.permute.xlu0 %268 }
 0x12a   :  { %v189_v44 = vsel %vm109_vm9, %v179_v30, 4294967295  ;;  %vm291_vm9 = vcmp.eq.s32.totalorder %v1687_v21, %v269_v54  ;;  %vm292_vm4 = vcmp.eq.s32.totalorder %v1690_v22, %v269_v54  ;;  %v523_v54 = vld [vmem:[%s2392_s2] sm:$0xff] }
 0x12b   :  { %1446 = vset.pattern.permute.xlu0 %v1491_v8  ;;  %vm307_vm10 = vmor %vm219_vm12, %vm291_vm9 }
 0x12c   :  { %336 = vperm.xlu0 %1446, %v124_v19   ;;  %vm308_vm3 = vmor %vm220_vm11, %vm292_vm4 }
 0x12e   :  { %1450 = vset.pattern.permute.xlu2 %v1491_v8  ;;  %392 = vperm.xlu1 %1448, %v156_v29  }
 0x12f   :  { %286 = vperm.xlu2 %1450, %v94_v26  }
 0x131   :  { %v325_v55 = vpop.permute.xlu1 %324 }
 0x132   :  { %vm347_vm6 = vcmp.eq.s32.totalorder %v1687_v21, %v325_v55  ;;  %vm348_vm5 = vcmp.eq.s32.totalorder %v1690_v22, %v325_v55 }
 0x133   :  { %vm363_vm14 = vmor %vm307_vm10, %vm347_vm6 }
 0x134   :  { %1452 = vset.pattern.permute.xlu0 %v1493_v10  ;;  %vm364_vm13 = vmor %vm308_vm3, %vm348_vm5 }
 0x135   :  { %395 = vperm.xlu0 %1452, %v157_v35   ;;  %v1415_v35 = vld [vmem:[%s2393_s3 + $0x8] sm:$0xff] }
 0x136   :  { %1451 = vset.pattern.permute.xlu1 %v1491_v8 }
 0x137   :  { %1455 = vset.pattern.permute.xlu2 %v1493_v10  ;;  %342 = vperm.xlu1 %1451, %v126_v37  }
 0x138   :  { %398 = vperm.xlu2 %1455, %v158_v38  }
 0x13d   :  { %454 = vperm.xlu0 %1452, %v190_v40  }
 0x13f   :  { %1453 = vset.pattern.permute.xlu1 %v1493_v10 }
 0x140   :  { %1456 = vset.pattern.permute.xlu2 %v1491_v8  ;;  %451 = vperm.xlu1 %1453, %v189_v44  }
 0x141   :  { %345 = vperm.xlu2 %1456, %v127_v45   ;;  %v2085_v45 = vld [vmem:[%s2392_s2 + $0x20] sm:$0xff] }
 0x145   :  { %401 = vperm.xlu0 %1452, %v159_v0   ;;  %v525_v0 = vld [vmem:[%s2392_s2 + $0x10] sm:$0xff] }
 0x148   :  { %1454 = vset.pattern.permute.xlu1 %v1491_v8 }
 0x149   :  { %289 = vperm.xlu1 %1454, %v95_v50   ;;  %v524_v50 = vld [vmem:[%s2392_s2 + $0x8] sm:$0xff] }
 0x151   :  { %1457 = vset.pattern.permute.xlu1 %v1493_v10  ;;  %v272_v10 = vpop.permute.xlu1 %271 }
 0x152   :  { %457 = vperm.xlu1 %1457, %v191_v52  }
 0x159   :  { %v275_v57 = vpop.permute.xlu1 %274 }
 0x15e   :  { %v437_v8 = vpop.permute.xlu2 %436  ;;  %v381_v18 = vpop.permute.xlu0 %380 }
 0x15f   :  { %vm459_vm0 = vcmp.eq.s32.totalorder %v1687_v21, %v437_v8  ;;  %vm403_vm15 = vcmp.eq.s32.totalorder %v1687_v21, %v381_v18  ;;  %vm404_vm8 = vcmp.eq.s32.totalorder %v1690_v22, %v381_v18  ;;  %vm460_vm2 = vcmp.eq.s32.totalorder %v1690_v22, %v437_v8 }
 0x160   :  { %vm419_vm7 = vmor %vm363_vm14, %vm403_vm15  ;;  %vm2410_vm14 = vcmp.eq.s32.totalorder %v1690_v22, %v1750_v33  ;;  %v1419_v33 = vld [vmem:[%s2393_s3 + $0x28] sm:$0xff] }
 0x161   :  { %vm475_vm12 = vmor %vm419_vm7, %vm459_vm0  ;;  %v1916_v58 = vpop.permute.xlu1 %277  ;;  %vm293_vm7 = vcmp.eq.s32.totalorder %v1687_v21, %v272_v10  ;;  %vm349_vm0 = vcmp.eq.s32.totalorder %v1687_v21, %v328_v51  ;;  %865 = vmatpush.bf16.msrb.mxu0 %v1419_v33  ;;  %v554_v33 = vld [vmem:[%s2391_s1 + $0xb8] sm:$0xff] }
 0x162   :  { %v1310_v5 = vsel %vm475_vm12, 1.0, %v1495_v56  ;;  %vm420_vm9 = vmor %vm364_vm13, %vm404_vm8  ;;  %vm294_vm8 = vcmp.eq.s32.totalorder %v1690_v22, %v272_v10  ;;  %v794_v10 = vpack.c.bf16 %v524_v50, %v523_v54 }
 0x163   :  { %579 = vmatmul.f32.vlgmr.msra.gmra.mxu0 %v1310_v5  ;;  %vm476_vm11 = vmor %vm420_vm9, %vm460_vm2  ;;  %727 = vmatmul.f32.vlgmr.msra.gmra.mxu3 %v1310_v5  ;;  %vm350_vm2 = vcmp.eq.s32.totalorder %v1690_v22, %v328_v51  ;;  %v795_v5 = vpack.c.bf16 %v526_v48, %v525_v0 }
 0x164   :  { %v1910_v20 = vsel %vm476_vm11, 1.0, %v1495_v56  ;;  %vm309_vm13 = vmor %vm221_vm1, %vm293_vm7 }
 0x165   :  { %620 = vmatmul.f32.vlgmr.msra.gmra.mxu1 %v1910_v20  ;;  %vm310_vm15 = vmor %vm2410_vm14, %vm294_vm8  ;;  %vm295_vm8 = vcmp.eq.s32.totalorder %v1687_v21, %v275_v57  ;;  %vm2411_vm14 = vcmp.eq.s32.totalorder %v1687_v21, %v1682_v17  ;;  %866 = vmatpush.bf16.msrb.mxu0 %v1418_v12  ;;  %v550_v12 = vld [vmem:[%s2391_s1 + $0x98] sm:$0xff] }
 0x166   :  { %v440_v60 = vpop.permute.xlu0 %439  ;;  %vm365_vm4 = vmor %vm309_vm13, %vm349_vm0  ;;  %vm296_vm13 = vcmp.eq.s32.totalorder %v1690_v22, %v275_v57  ;;  %vm2412_vm0 = vcmp.eq.s32.totalorder %v1690_v22, %v1682_v17 }
 0x167   :  { %v334_v61 = vpop.permute.xlu2 %333  ;;  %vm366_vm5 = vmor %vm310_vm15, %vm350_vm2  ;;  %vm461_vm3 = vcmp.eq.s32.totalorder %v1687_v21, %v440_v60  ;;  %vm462_vm9 = vcmp.eq.s32.totalorder %v1690_v22, %v440_v60  ;;  %v558_v60 = vld [vmem:[%s2391_s1 + $0xd8] sm:$0xff] }
 0x168   :  { %vm311_vm15 = vmor %vm2411_vm14, %vm295_vm8 }
 0x169   :  { %vm312_vm2 = vmor %vm2412_vm0, %vm296_vm13  ;;  %867 = vmatpush.bf16.msrb.mxu0 %v1417_v15  ;;  %vm297_vm13 = vcmp.eq.s32.totalorder %v1687_v21, %v1916_v58  ;;  %vm353_vm0 = vcmp.eq.s32.totalorder %v1687_v21, %v334_v61  ;;  %v548_v15 = vld [vmem:[%s2391_s1 + $0x88] sm:$0xff] }
 0x16d   :  { %868 = vmatpush.bf16.msrb.mxu0 %v1416_v25 }
 0x16f   :  { %v281_v6 = vpop.permute.xlu2 %280 }
 0x171   :  { %869 = vmatpush.bf16.msrb.mxu0 %v1415_v35  ;;  %v538_v35 = vld [vmem:[%s2391_s1 + $0x38] sm:$0xff] }
 0x175   :  { %870 = vmatpush.bf16.msrb.mxu0 %v1414_v11  ;;  %v534_v11 = vld [vmem:[%s2391_s1 + $0x18] sm:$0xff] }
 0x177   :  { %v1972_v19 = vpop.permute.xlu2 %339 }
 0x17e   :  { %v384_v63 = vpop.permute.xlu1 %383 }
 0x17f   :  { %vm405_vm6 = vcmp.eq.s32.totalorder %v1687_v21, %v384_v63  ;;  %vm406_vm10 = vcmp.eq.s32.totalorder %v1690_v22, %v384_v63 }
 0x180   :  { %vm421_vm1 = vmor %vm365_vm4, %vm405_vm6  ;;  %vm351_vm4 = vcmp.eq.s32.totalorder %v1687_v21, %v1892_v53 }
 0x181   :  { %vm477_vm12 = vmor %vm421_vm1, %vm461_vm3 }
 0x182   :  { %v1312_v1 = vsel %vm477_vm12, 1.0, %v1495_v56  ;;  %vm422_vm11 = vmor %vm366_vm5, %vm406_vm10  ;;  %vm352_vm10 = vcmp.eq.s32.totalorder %v1690_v22, %v1892_v53 }
 0x183   :  { %582 = vmatmul.f32.gmra.mxu0 %v1312_v1  ;;  %vm478_vm7 = vmor %vm422_vm11, %vm462_vm9  ;;  %730 = vmatmul.f32.gmra.mxu3 %v1312_v1 }
 0x184   :  { %v1940_v4 = vsel %vm478_vm7, 1.0, %v1495_v56  ;;  %vm367_vm3 = vmor %vm311_vm15, %vm351_vm4  ;;  %vm298_vm15 = vcmp.eq.s32.totalorder %v1690_v22, %v1916_v58  ;;  %v562_v58 = vld [vmem:[%s2391_s1 + $0xf8] sm:$0xff] }
 0x185   :  { %623 = vmatmul.f32.gmra.mxu1 %v1940_v4  ;;  %vm368_vm1 = vmor %vm312_vm2, %vm352_vm10  ;;  %vm2413_vm2 = vcmp.eq.s32.totalorder %v1687_v21, %v1728_v32  ;;  %vm2414_vm10 = vcmp.eq.s32.totalorder %v1690_v22, %v1728_v32  ;;  %v449_v32 = vpop.permute.xlu2 %448 }
 0x186   :  { %v387_v9 = vpop.permute.xlu1 %386  ;;  %vm313_vm4 = vmor %vm2413_vm2, %vm297_vm13  ;;  %vm300_vm2 = vcmp.eq.s32.totalorder %v1690_v22, %v281_v6 }
 0x187   :  { %vm407_vm6 = vcmp.eq.s32.totalorder %v1687_v21, %v387_v9  ;;  %vm408_vm5 = vcmp.eq.s32.totalorder %v1690_v22, %v387_v9 }
 0x188   :  { %vm423_vm12 = vmor %vm367_vm3, %vm407_vm6  ;;  %vm354_vm6 = vcmp.eq.s32.totalorder %v1690_v22, %v334_v61  ;;  %v556_v61 = vld [vmem:[%s2391_s1 + $0xc8] sm:$0xff] }
 0x189   :  { %vm424_vm7 = vmor %vm368_vm1, %vm408_vm5 }
 0x18a   :  { %vm314_vm5 = vmor %vm2414_vm10, %vm298_vm15  ;;  %vm299_vm15 = vcmp.eq.s32.totalorder %v1687_v21, %v281_v6  ;;  %vm2416_vm10 = vcmp.eq.s32.totalorder %v1690_v22, %v1726_v31  ;;  %v552_v6 = vld [vmem:[%s2391_s1 + $0xa8] sm:$0xff] }
 0x18b   :  { %vm369_vm3 = vmor %vm313_vm4, %vm353_vm0  ;;  %vm2415_vm4 = vcmp.eq.s32.totalorder %v1687_v21, %v1726_v31 }
 0x18c   :  { %vm370_vm1 = vmor %vm314_vm5, %vm354_vm6 }
 0x18d   :  { %v443_v3 = vpop.permute.xlu0 %442  ;;  %vm315_vm6 = vmor %vm2415_vm4, %vm299_vm15  ;;  %vm468_vm15 = vcmp.eq.s32.totalorder %v1690_v22, %v449_v32  ;;  %v287_v2 = vpop.permute.xlu2 %286 }
 0x18e   :  { %vm463_vm9 = vcmp.eq.s32.totalorder %v1687_v21, %v443_v3  ;;  %vm464_vm11 = vcmp.eq.s32.totalorder %v1690_v22, %v443_v3  ;;  %vm316_vm5 = vmor %vm2416_vm10, %vm300_vm2  ;;  %vm303_vm4 = vcmp.eq.s32.totalorder %v1687_v21, %v287_v2 }
 0x18f   :  { %v1965_v17 = vpop.permute.xlu1 %283  ;;  %vm479_vm8 = vmor %vm423_vm12, %vm463_vm9 }
 0x190   :  { %v1314_v16 = vsel %vm479_vm8, 1.0, %v1495_v56  ;;  %vm480_vm14 = vmor %vm424_vm7, %vm464_vm11  ;;  %vm302_vm10 = vcmp.eq.s32.totalorder %v1690_v22, %v1965_v17 }
 0x191   :  { %585 = vmatmul.f32.gmra.mxu0 %v1314_v16  ;;  %v1975_v24 = vsel %vm480_vm14, 1.0, %v1495_v56  ;;  %733 = vmatmul.f32.gmra.mxu3 %v1314_v16 }
 0x192   :  { %626 = vmatmul.f32.gmra.mxu1 %v1975_v24 }
 0x195   :  { %v390_v29 = vpop.permute.xlu0 %389  ;;  %v399_v42 = vpop.permute.xlu2 %398 }
 0x196   :  { %vm409_vm12 = vcmp.eq.s32.totalorder %v1687_v21, %v390_v29  ;;  %vm410_vm9 = vcmp.eq.s32.totalorder %v1690_v22, %v390_v29  ;;  %v544_v29 = vld [vmem:[%s2391_s1 + $0x68] sm:$0xff] }
 0x197   :  { %vm425_vm11 = vmor %vm369_vm3, %vm409_vm12 }
 0x198   :  { %v446_v26 = vpop.permute.xlu1 %445  ;;  %vm426_vm7 = vmor %vm370_vm1, %vm410_vm9 }
 0x199   :  { %vm465_vm8 = vcmp.eq.s32.totalorder %v1687_v21, %v446_v26  ;;  %vm466_vm13 = vcmp.eq.s32.totalorder %v1690_v22, %v446_v26  ;;  %v542_v26 = vld [vmem:[%s2391_s1 + $0x58] sm:$0xff] }
 0x19a   :  { %vm481_vm14 = vmor %vm425_vm11, %vm465_vm8  ;;  %vm467_vm8 = vcmp.eq.s32.totalorder %v1687_v21, %v449_v32 }
 0x19b   :  { %v1316_v27 = vsel %vm481_vm14, 1.0, %v1495_v56  ;;  %vm482_vm0 = vmor %vm426_vm7, %vm466_vm13 }
 0x19c   :  { %588 = vmatmul.f32.gmra.mxu0 %v1316_v27  ;;  %v1997_v28 = vsel %vm482_vm0, 1.0, %v1495_v56  ;;  %736 = vmatmul.f32.gmra.mxu3 %v1316_v27 }
 0x19d   :  { %629 = vmatmul.f32.gmra.mxu1 %v1997_v28  ;;  %v346_v51 = vpop.permute.xlu2 %345 }
 0x19e   :  { %v337_v34 = vpop.permute.xlu0 %336 }
 0x19f   :  { %vm355_vm3 = vcmp.eq.s32.totalorder %v1687_v21, %v337_v34  ;;  %vm356_vm1 = vcmp.eq.s32.totalorder %v1690_v22, %v337_v34  ;;  %v540_v34 = vld [vmem:[%s2391_s1 + $0x48] sm:$0xff] }
 0x1a0   :  { %vm371_vm12 = vmor %vm315_vm6, %vm355_vm3  ;;  %v393_v36 = vpop.permute.xlu1 %392  ;;  %vm301_vm6 = vcmp.eq.s32.totalorder %v1687_v21, %v1965_v17  ;;  %vm2417_vm3 = vcmp.eq.s32.totalorder %v1687_v21, %v1658_v62 }
 0x1a1   :  { %vm372_vm9 = vmor %vm316_vm5, %vm356_vm1  ;;  %vm411_vm11 = vcmp.eq.s32.totalorder %v1687_v21, %v393_v36  ;;  %vm412_vm7 = vcmp.eq.s32.totalorder %v1690_v22, %v393_v36  ;;  %vm304_vm5 = vcmp.eq.s32.totalorder %v1690_v22, %v287_v2 }
 0x1a2   :  { %vm427_vm13 = vmor %vm371_vm12, %vm411_vm11  ;;  %vm2420_vm12 = vcmp.eq.s32.totalorder %v1687_v21, %v1672_v13  ;;  %vm2421_vm11 = vcmp.eq.s32.totalorder %v1690_v22, %v1672_v13  ;;  %v2059_v13 = vld [vmem:[%s2392_s2 + $0x38] sm:$0xff] }
 0x1a3   :  { %vm483_vm14 = vmor %vm427_vm13, %vm467_vm8  ;;  %vm357_vm8 = vcmp.eq.s32.totalorder %v1687_v21, %v1972_v19  ;;  %vm2422_vm13 = vcmp.eq.s32.totalorder %v1690_v22, %v1658_v62  ;;  %v2064_v62 = vld [vmem:[%s2392_s2 + $0x30] sm:$0xff]  ;;  %678 = vmatpush.msra.mxu2 %v2059_v13 }
 0x1a4   :  { %v1318_v31 = vsel %vm483_vm14, 1.0, %v1495_v56  ;;  %vm428_vm0 = vmor %vm372_vm9, %vm412_vm7 }
 0x1a5   :  { %591 = vmatmul.f32.gmra.mxu0 %v1318_v31  ;;  %vm484_vm2 = vmor %vm428_vm0, %vm468_vm15  ;;  %739 = vmatmul.f32.gmra.mxu3 %v1318_v31  ;;  %vm358_vm0 = vcmp.eq.s32.totalorder %v1690_v22, %v1972_v19  ;;  %v546_v19 = vld [vmem:[%s2391_s1 + $0x78] sm:$0xff] }
 0x1a6   :  { %v2017_v37 = vsel %vm484_vm2, 1.0, %v1495_v56  ;;  %vm2032_vm1 = vmor %vm2417_vm3, %vm303_vm4  ;;  %679 = vmatpush.msra.mxu2 %v2064_v62 }
 0x1a7   :  { %632 = vmatmul.f32.gmra.mxu1 %v2017_v37  ;;  %v396_v7 = vpop.permute.xlu0 %395  ;;  %vm317_vm9 = vmor %vm2420_vm12, %vm301_vm6 }
 0x1a8   :  { %vm318_vm7 = vmor %vm2421_vm11, %vm302_vm10  ;;  %vm413_vm15 = vcmp.eq.s32.totalorder %v1687_v21, %v396_v7  ;;  %vm414_vm2 = vcmp.eq.s32.totalorder %v1690_v22, %v396_v7  ;;  %680 = vmatpush.msra.mxu2 %v2070_v41  ;;  %v532_v7 = vld [vmem:[%s2391_s1 + $0x8] sm:$0xff] }
 0x1a9   :  { %v343_v38 = vpop.permute.xlu1 %342  ;;  %vm2047_vm14 = vmor %vm2422_vm13, %vm304_vm5 }
 0x1aa   :  { %vm373_vm4 = vmor %vm317_vm9, %vm357_vm8  ;;  %vm359_vm6 = vcmp.eq.s32.totalorder %v1687_v21, %v343_v38  ;;  %vm360_vm12 = vcmp.eq.s32.totalorder %v1690_v22, %v343_v38  ;;  %681 = vmatpush.msra.mxu2 %v2085_v45  ;;  %v536_v38 = vld [vmem:[%s2391_s1 + $0x28] sm:$0xff] }
 0x1ab   :  { %vm374_vm10 = vmor %vm318_vm7, %vm358_vm0 }
 0x1ac   :  { %vm429_vm5 = vmor %vm373_vm4, %vm413_vm15  ;;  %vm415_vm15 = vcmp.eq.s32.totalorder %v1687_v21, %v399_v42  ;;  %682 = vmatpush.msra.mxu2 %v526_v48 }
 0x1ad   :  { %vm430_vm3 = vmor %vm374_vm10, %vm414_vm2  ;;  %vm416_vm2 = vcmp.eq.s32.totalorder %v1690_v22, %v399_v42 }
 0x1ae   :  { %vm2075_vm9 = vmor %vm2032_vm1, %vm359_vm6  ;;  %683 = vmatpush.msra.mxu2 %v525_v0  ;;  %v1429_v0 = vld [vmem:[%s2394_s4 + $0x38] sm:$0xff] }
 0x1af   :  { %v455_v44 = vpop.permute.xlu0 %454  ;;  %vm376_vm1 = vmor %vm2047_vm14, %vm360_vm12  ;;  %1043 = vmatpush.bf16.msrb.mxu1 %v1429_v0 }
 0x1b0   :  { %vm471_vm0 = vcmp.eq.s32.totalorder %v1687_v21, %v455_v44  ;;  %vm472_vm14 = vcmp.eq.s32.totalorder %v1690_v22, %v455_v44  ;;  %vm431_vm4 = vmor %vm2075_vm9, %vm415_vm15  ;;  %684 = vmatpush.msra.mxu2 %v524_v50  ;;  %vm2427_vm9 = vcmp.eq.s32.totalorder %v1687_v21, %v1692_v23 }
 0x1b1   :  { %vm432_vm6 = vmor %vm376_vm1, %vm416_vm2  ;;  %vm362_vm1 = vcmp.eq.s32.totalorder %v1690_v22, %v346_v51 }
 0x1b2   :  { %v452_v30 = vpop.permute.xlu1 %451  ;;  %vm487_vm10 = vmor %vm431_vm4, %vm471_vm0  ;;  %685 = vmatpush.msra.mxu2 %v523_v54 }
 0x1b3   :  { %vm469_vm11 = vcmp.eq.s32.totalorder %v1687_v21, %v452_v30  ;;  %vm470_vm7 = vcmp.eq.s32.totalorder %v1690_v22, %v452_v30  ;;  %v1322_v52 = vsel %vm487_vm10, 1.0, %v1495_v56 }
 0x1b4   :  { %vm485_vm8 = vmor %vm429_vm5, %vm469_vm11  ;;  %752 = vmatpush.xpose.msrb.mxu2 %v562_v58 }
 0x1b5   :  { %v1320_v46 = vsel %vm485_vm8, 1.0, %v1495_v56  ;;  %vm486_vm13 = vmor %vm430_vm3, %vm470_vm7  ;;  %vm2428_vm7 = vcmp.eq.s32.totalorder %v1690_v22, %v1692_v23 }
 0x1b6   :  { %594 = vmatmul.f32.gmra.mxu0 %v1320_v46  ;;  %v2092_v47 = vsel %vm486_vm13, 1.0, %v1495_v56  ;;  %742 = vmatmul.f32.gmra.mxu3 %v1320_v46  ;;  %vm488_vm5 = vmor %vm432_vm6, %vm472_vm14  ;;  %vm361_vm13 = vcmp.eq.s32.totalorder %v1687_v21, %v346_v51  ;;  %v2208_v51 = vld [vmem:[%s2395_s5] sm:$0xff] }
 0x1b7   :  { %635 = vmatmul.f32.gmra.mxu1 %v2092_v47  ;;  %v2118_v53 = vsel %vm488_vm5, 1.0, %v1495_v56  ;;  %v402_v55 = vpop.permute.xlu0 %401 }
 0x1b8   :  { %vm417_vm2 = vcmp.eq.s32.totalorder %v1687_v21, %v402_v55  ;;  %vm418_vm14 = vcmp.eq.s32.totalorder %v1690_v22, %v402_v55  ;;  %753 = vmatpush.xpose.msrb.mxu2 %v560_v59 }
 0x1bb   :  { %v290_v49 = vpop.permute.xlu1 %289 }
 0x1bc   :  { %vm305_vm3 = vcmp.eq.s32.totalorder %v1687_v21, %v290_v49  ;;  %vm306_vm12 = vcmp.eq.s32.totalorder %v1690_v22, %v290_v49  ;;  %754 = vmatpush.xpose.msrb.mxu2 %v558_v60 }
 0x1bd   :  { %vm321_vm11 = vmor %vm2427_vm9, %vm305_vm3  ;;  %vm645_vm9 = vcmask 523264  }
 0x1be   :  { %597 = vmatmul.f32.gmra.mxu0 %v1322_v52  ;;  %745 = vmatmul.f32.gmra.mxu3 %v1322_v52  ;;  %vm322_vm8 = vmor %vm2428_vm7, %vm306_vm12 }
 0x1bf   :  { %638 = vmatmul.f32.gmra.mxu1 %v2118_v53  ;;  %vm377_vm15 = vmor %vm321_vm11, %vm361_vm13 }
 0x1c0   :  { %vm378_vm0 = vmor %vm322_vm8, %vm362_vm1  ;;  %755 = vmatpush.xpose.msrb.mxu2 %v556_v61 }
 0x1c1   :  { %vm433_vm4 = vmor %vm377_vm15, %vm417_vm2 }
 0x1c2   :  { %vm434_vm5 = vmor %vm378_vm0, %vm418_vm14 }
 0x1c4   :  { %v458_v8 = vpop.permute.xlu1 %457  ;;  %756 = vmatpush.xpose.msrb.mxu2 %v554_v33 }
 0x1c5   :  { %vm473_vm6 = vcmp.eq.s32.totalorder %v1687_v21, %v458_v8  ;;  %vm474_vm10 = vcmp.eq.s32.totalorder %v1690_v22, %v458_v8  ;;  %v797_v21 = vpack.c.bf16 %v2059_v13, %v2064_v62 }
 0x1c6   :  { %vm489_vm3 = vmor %vm433_vm4, %vm473_vm6 }
 0x1c7   :  { %v1324_v23 = vsel %vm489_vm3, 1.0, %v1495_v56  ;;  %vm490_vm12 = vmor %vm434_vm5, %vm474_vm10 }
 0x1c8   :  { %600 = vmatmul.f32.gmra.mxu0 %v1324_v23  ;;  %v2135_v18 = vsel %vm490_vm12, 1.0, %v1495_v56  ;;  %748 = vmatmul.f32.gmra.mxu3 %v1324_v23  ;;  %v796_v56 = vpack.c.bf16 %v2070_v41, %v2085_v45 }
 0x1c9   :  { %641 = vmatmul.f32.gmra.mxu1 %v2135_v18  ;;  %757 = vmatpush.xpose.msrb.mxu2 %v552_v6 }
 0x1cd   :  { %758 = vmatpush.xpose.msrb.mxu2 %v550_v12 }
 0x1d0   :  { %871 = vmatmul.bf16.vlgmr.msrb.gmra.mxu0 %v794_v10 }
 0x1d1   :  { %759 = vmatpush.xpose.msrb.mxu2 %v548_v15 }
 0x1d5   :  { %760 = vmatpush.xpose.msrb.mxu2 %v546_v19 }
 0x1d9   :  { %761 = vmatpush.xpose.msrb.mxu2 %v544_v29 }
 0x1dd   :  { %762 = vmatpush.xpose.msrb.mxu2 %v542_v26 }
 0x1e0   :  { %v580_v57 = vpop.f32.mrf.mxu0  ;;  %876 = vmatmul.bf16.gmra.mxu0 %v795_v5 }
 0x1e1   :  { %763 = vmatpush.xpose.msrb.mxu2 %v540_v34 }
 0x1e2   :  { %v621_v22 = vpop.f32.mrf.mxu1 }
 0x1e3   :  { %v622_v14 = vadd.f32 %v621_v22, %v580_v57 }
 0x1e5   :  { %1342 = vmatmul.msk.f32.vlgmr.msra.gmra.mxu2 %vm645_vm9, %v622_v14 }
 0x1e6   :  { %764 = vmatpush.xpose.msrb.mxu2 %v538_v35 }
 0x1ea   :  { %765 = vmatpush.xpose.msrb.mxu2 %v536_v38  ;;  %v1427_v38 = vld [vmem:[%s2394_s4 + $0x28] sm:$0xff] }
 0x1ee   :  { %766 = vmatpush.xpose.msrb.mxu2 %v534_v11 }
 0x1f0   :  { %881 = vmatmul.bf16.gmra.mxu0 %v796_v56 }
 0x1f2   :  { %767 = vmatpush.xpose.msrb.mxu2 %v532_v7 }
 0x200   :  { %v583_v63 = vpop.f32.mrf.mxu0  ;;  %886 = vmatmul.bf16.gmra.mxu0 %v797_v21 }
 0x202   :  { %v624_v1 = vpop.f32.mrf.mxu1 }
 0x203   :  { %v625_v9 = vadd.f32 %v624_v1, %v583_v63 }
 0x205   :  { %1343 = vmatmul.msk.f32.gmra.mxu2 %vm645_vm9, %v625_v9 }
 0x20e   :  { %v586_v3 = vpop.f32.mrf.mxu0 }
 0x20f   :  { %v627_v17 = vpop.f32.mrf.mxu1 }
 0x210   :  { %v628_v16 = vadd.f32 %v627_v17, %v586_v3 }
 0x212   :  { %1344 = vmatmul.msk.f32.gmra.mxu2 %vm645_vm9, %v628_v16 }
 0x219   :  { %v589_v25 = vpop.f32.mrf.mxu0 }
 0x21a   :  { %v630_v32 = vpop.f32.mrf.mxu1 }
 0x21b   :  { %v631_v27 = vadd.f32 %v630_v32, %v589_v25 }
 0x21d   :  { %1345 = vmatmul.msk.f32.gmra.mxu2 %vm645_vm9, %v631_v27  ;;  %v1428_v27 = vld [vmem:[%s2394_s4 + $0x30] sm:$0xff] }
 0x21e   :  { %1044 = vmatpush.bf16.msrb.mxu1 %v1428_v27 }
 0x222   :  { %v592_v36 = vpop.f32.mrf.mxu0  ;;  %1045 = vmatpush.bf16.msrb.mxu1 %v1427_v38 }
 0x224   :  { %v633_v31 = vpop.f32.mrf.mxu1 }
 0x225   :  { %v634_v2 = vadd.f32 %v633_v31, %v592_v36 }
 0x227   :  { %1346 = vmatmul.msk.f32.gmra.mxu2 %vm645_vm9, %v634_v2 }
 0x233   :  { %v595_v39 = vpop.f32.mrf.mxu0 }
 0x234   :  { %v636_v40 = vpop.f32.mrf.mxu1 }
 0x235   :  { %v637_v13 = vadd.f32 %v636_v40, %v595_v39 }
 0x237   :  { %1347 = vmatmul.msk.f32.gmra.mxu2 %vm645_vm9, %v637_v13  ;;  %v1426_v13 = vld [vmem:[%s2394_s4 + $0x20] sm:$0xff] }
 0x238   :  { %1046 = vmatpush.bf16.msrb.mxu1 %v1426_v13  ;;  %v994_v13 = vperm.slane %v2208_v51, 1 }
 0x23b   :  { %v598_v62 = vpop.f32.mrf.mxu0 }
 0x23c   :  { %v639_v30 = vpop.f32.mrf.mxu1 }
 0x23d   :  { %v640_v41 = vadd.f32 %v639_v30, %v598_v62 }
 0x23f   :  { %1348 = vmatmul.msk.f32.gmra.mxu2 %vm645_vm9, %v640_v41 }
 0x245   :  { %v601_v42 = vpop.f32.mrf.mxu0 }
 0x246   :  { %v642_v43 = vpop.f32.mrf.mxu1 }
 0x247   :  { %v643_v44 = vadd.f32 %v642_v43, %v601_v42  ;;  %v1425_v42 = vld [vmem:[%s2394_s4 + $0x18] sm:$0xff] }
 0x248   :  { %1047 = vmatpush.bf16.msrb.mxu1 %v1425_v42 }
 0x249   :  { %1349 = vmatmul.msk.f32.gmra.mxu2 %vm645_vm9, %v643_v44 }
 0x24d   :  { %v872_v45 = vpop.f32.mrf.mxu0 }
 0x251   :  { %768 = vmatmul.f32.vlgmr.msrb.gmra.mxu2 %v1910_v20  ;;  %v814_v20 = vperm.slane %v2208_v51, 0 }
 0x255   :  { %v874_v46 = vpop.f32.mrf.mxu0 }
 0x259   :  { %771 = vmatmul.f32.gmra.mxu2 %v1940_v4  ;;  %v875_v4 = vadd.f32 %v874_v46, %v814_v20 }
 0x25b   :  { %v2212_v55 = vmax.f32 %v875_v4, 0.0 }
 0x25d   :  { %v877_v48 = vpop.f32.mrf.mxu0  ;;  %v915_v5 = vmul.f32 %v2212_v55, %v2212_v55 }
 0x25e   :  { %v878_v54 = vadd.f32 %v877_v48, %v814_v20  ;;  %v1424_v48 = vld [vmem:[%s2394_s4 + $0x10] sm:$0xff] }
 0x25f   :  { %1048 = vmatpush.bf16.msrb.mxu1 %v1424_v48 }
 0x261   :  { %774 = vmatmul.f32.gmra.mxu2 %v1975_v24  ;;  %v873_v24 = vadd.f32 %v872_v45, %v814_v20 }
 0x263   :  { %v2214_v23 = vmax.f32 %v873_v24, 0.0  ;;  %v1422_v24 = vld [vmem:[%s2394_s4] sm:$0xff] }
 0x265   :  { %v879_v49 = vpop.f32.mrf.mxu0  ;;  %v914_v21 = vmul.f32 %v2214_v23, %v2214_v23  ;;  %v900_v14 = vadd.f32 %v2212_v55, %v2214_v23 }
 0x266   :  { %v880_v8 = vadd.f32 %v879_v49, %v814_v20 }
 0x267   :  { %v922_v59 = vadd.f32 %v915_v5, %v914_v21 }
 0x268   :  { %v2221_v57 = vmax.f32 %v880_v8, 0.0 }
 0x269   :  { %777 = vmatmul.f32.gmra.mxu2 %v1997_v28  ;;  %v2217_v28 = vmax.f32 %v878_v54, 0.0 }
 0x26a   :  { %v917_v61 = vmul.f32 %v2221_v57, %v2221_v57 }
 0x26b   :  { %v916_v56 = vmul.f32 %v2217_v28, %v2217_v28  ;;  %v901_v60 = vadd.f32 %v900_v14, %v2217_v28 }
 0x26d   :  { %v882_v50 = vpop.f32.mrf.mxu0  ;;  %v923_v33 = vadd.f32 %v922_v59, %v916_v56  ;;  %v902_v1 = vadd.f32 %v901_v60, %v2221_v57 }
 0x26e   :  { %v883_v10 = vadd.f32 %v882_v50, %v814_v20 }
 0x26f   :  { %v924_v12 = vadd.f32 %v923_v33, %v917_v61 }
 0x271   :  { %780 = vmatmul.f32.gmra.mxu2 %v2017_v37 }
 0x275   :  { %v884_v52 = vpop.f32.mrf.mxu0 }
 0x276   :  { %v885_v37 = vadd.f32 %v884_v52, %v814_v20 }
 0x278   :  { %v2234_v63 = vmax.f32 %v885_v37, 0.0 }
 0x279   :  { %783 = vmatmul.f32.gmra.mxu2 %v2092_v47  ;;  %v2229_v47 = vmax.f32 %v883_v10, 0.0 }
 0x27a   :  { %v919_v3 = vmul.f32 %v2234_v63, %v2234_v63 }
 0x27b   :  { %v918_v9 = vmul.f32 %v2229_v47, %v2229_v47  ;;  %v903_v15 = vadd.f32 %v902_v1, %v2229_v47 }
 0x27d   :  { %v887_v22 = vpop.f32.mrf.mxu0  ;;  %v925_v16 = vadd.f32 %v924_v12, %v918_v9  ;;  %v904_v19 = vadd.f32 %v903_v15, %v2234_v63 }
 0x27e   :  { %v888_v58 = vadd.f32 %v887_v22, %v814_v20 }
 0x27f   :  { %v926_v25 = vadd.f32 %v925_v16, %v919_v3 }
 0x280   :  { %v2240_v6 = vmax.f32 %v888_v58, 0.0 }
 0x281   :  { %786 = vmatmul.f32.gmra.mxu2 %v2118_v53 }
 0x282   :  { %v920_v53 = vmul.f32 %v2240_v6, %v2240_v6  ;;  %v905_v26 = vadd.f32 %v904_v19, %v2240_v6 }
 0x284   :  { %v927_v34 = vadd.f32 %v926_v25, %v920_v53 }
 0x285   :  { %v889_v17 = vpop.f32.mrf.mxu0 }
 0x286   :  { %v890_v29 = vadd.f32 %v889_v17, %v814_v20  ;;  %v1423_v20 = vld [vmem:[%s2394_s4 + $0x8] sm:$0xff]  ;;  %s1496_s4 = smov [#allocation2]  }
 0x287   :  { %1049 = vmatpush.bf16.msrb.mxu1 %v1423_v20  ;;  %s1256_s21 = sshll.u32 %s1496_s4, 4  ;;  %s1257_s21 = int_to_ptr.vmem [resolvable:$true] %s1256_s21 }
 0x288   :  { %v899_v32 = vmax.f32 %v890_v29, 0.0 }
 0x289   :  { %789 = vmatmul.f32.gmra.mxu2 %v2135_v18 }
 0x28a   :  { %v906_v35 = vadd.f32 %v905_v26, %v899_v32  ;;  %v921_v36 = vmul.f32 %v899_v32, %v899_v32 }
 0x28b   :  { %1050 = vmatpush.bf16.msrb.mxu1 %v1422_v24 }
 0x28c   :  { %v907_v31 = vrot.slane %v906_v35, 4  ;;  %v928_v2 = vadd.f32 %v927_v34, %v921_v36  ;;  %v2280_v36 = vpop.f32.mrf.mxu2 }
 0x28e   :  { %v908_v11 = vadd.f32 %v907_v31, %v906_v35  ;;  %v929_v7 = vrot.slane %v928_v2, 4 }
 0x290   :  { %v909_v39 = vrot.slane %v908_v11, 2  ;;  %v930_v40 = vadd.f32 %v929_v7, %v928_v2 }
 0x292   :  { %v910_v18 = vadd.f32 %v909_v39, %v908_v11  ;;  %v931_v62 = vrot.slane %v930_v40, 2 }
 0x294   :  { %v911_v30 = vrot.slane %v910_v18, 1  ;;  %v932_v41 = vadd.f32 %v931_v62, %v930_v40  ;;  %v2282_v31 = vpop.f32.mrf.mxu2 }
 0x296   :  { %v912_v43 = vadd.f32 %v911_v30, %v910_v18  ;;  %v933_v44 = vrot.slane %v932_v41, 1 }
 0x298   :  { %v913_v45 = vmul.f32 0.015625, %v912_v43  ;;  %v934_v46 = vadd.f32 %v933_v44, %v932_v41 }
 0x29a   :  { %v935_v0 = vmul.f32 0.015625, %v934_v46  ;;  %v936_v49 = vmul.f32 %v913_v45, %v913_v45 }
 0x29c   :  { %v937_v50 = vsub.f32 %v935_v0, %v936_v49 }
 0x29e   :  { %v938_v4 = vmax.f32 %v937_v50, 0.0 }
 0x2a0   :  { %v939_v52 = vadd.f32 1e-05, %v938_v4 }
 0x2a2   :  { %1458 = vrsqrt.f32 %v939_v52  ;;  %vm946_vm7 = vweird.f32 %v939_v52 }
 0x2a8   :  { %v1459_v54 = vpop.eup %1458 }
 0x2a9   :  { %v941_v8 = vmul.f32 %v1459_v54, %v939_v52  ;;  %vm947_vm11 = vweird.f32 %v1459_v54 }
 0x2aa   :  { %vm948_vm8 = vmor %vm946_vm7, %vm947_vm11 }
 0x2ab   :  { %v942_v10 = vmul.f32 %v1459_v54, %v941_v8 }
 0x2ad   :  { %v943_v5 = vmul.f32 0.5, %v942_v10 }
 0x2af   :  { %v944_v37 = vsub.f32 1.5, %v943_v5 }
 0x2b1   :  { %v945_v21 = vmul.f32 %v1459_v54, %v944_v37 }
 0x2b3   :  { %v949_v22 = vsel %vm948_vm8, %v1459_v54, %v945_v21 }
 0x2b4   :  { %v950_v14 = vmul.f32 %v949_v22, %v2208_v51 }
 0x2b6   :  { %v951_v56 = vmul.f32 %v950_v14, %v913_v45  ;;  %v956_v59 = vperm.slane %v950_v14, 2 }
 0x2b8   :  { %v953_v58 = vrot.slane %v951_v56, 7  ;;  %v957_v33 = vmul.f32 %v956_v59, %v2214_v23  ;;  %v958_v1 = vmul.f32 %v956_v59, %v2212_v55  ;;  %v963_v9 = vmul.f32 %v956_v59, %v2240_v6 }
 0x2b9   :  { %v964_v12 = vmul.f32 %v956_v59, %v899_v32  ;;  %v959_v29 = vmul.f32 %v956_v59, %v2217_v28  ;;  %v960_v25 = vmul.f32 %v956_v59, %v2221_v57  ;;  %v961_v55 = vmul.f32 %v956_v59, %v2229_v47  ;;  %v2284_v28 = vpop.f32.mrf.mxu2 }
 0x2ba   :  { %v955_v60 = vsub.f32 %v2208_v51, %v953_v58  ;;  %v962_v23 = vmul.f32 %v956_v59, %v2234_v63 }
 0x2bc   :  { %v965_v61 = vperm.slane %v955_v60, 3 }
 0x2be   :  { %v966_v15 = vadd.f32 %v965_v61, %v957_v33  ;;  %v967_v3 = vadd.f32 %v965_v61, %v958_v1  ;;  %v972_v17 = vadd.f32 %v965_v61, %v963_v9  ;;  %v973_v16 = vadd.f32 %v965_v61, %v964_v12  ;;  %v728_v9 = vpop.f32.mrf.mxu3 }
 0x2bf   :  { %v968_v26 = vadd.f32 %v965_v61, %v959_v29  ;;  %v969_v27 = vadd.f32 %v965_v61, %v960_v25  ;;  %v970_v6 = vadd.f32 %v965_v61, %v961_v55  ;;  %v971_v32 = vadd.f32 %v965_v61, %v962_v23 }
 0x2c0   :  { %v974_v19 = vpack.c.bf16 %v967_v3, %v966_v15  ;;  %v977_v53 = vpack.c.bf16 %v973_v16, %v972_v17 }
 0x2c1   :  { %v975_v34 = vpack.c.bf16 %v969_v27, %v968_v26  ;;  %v976_v35 = vpack.c.bf16 %v971_v32, %v970_v6  ;;  %v2286_v2 = vpop.f32.mrf.mxu2 }
 0x2c2   :  { %1051 = vmatmul.bf16.vlgmr.msrb.gmra.mxu1 %v974_v19 }
 0x2c6   :  { %v731_v23 = vpop.f32.mrf.mxu3 }
 0x2c9   :  { %v2288_v11 = vpop.f32.mrf.mxu2 }
 0x2d1   :  { %v2290_v7 = vpop.f32.mrf.mxu2 }
 0x2d2   :  { %1056 = vmatmul.bf16.gmra.mxu1 %v975_v34 }
 0x2d9   :  { %v2292_v39 = vpop.f32.mrf.mxu2 }
 0x2e1   :  { %v2295_v18 = vpop.f32.mrf.mxu2 }
 0x2e2   :  { %1061 = vmatmul.bf16.gmra.mxu1 %v976_v35 }
 0x2e9   :  { %v2303_v0 = vpop.f32.mrf.mxu2 }
 0x2f1   :  { %v2330_v12 = vpop.f32.mrf.mxu2 }
 0x2f2   :  { %1066 = vmatmul.bf16.gmra.mxu1 %v977_v53 }
 0x2f9   :  { %v775_v35 = vpop.f32.mrf.mxu2 }
 0x33f   :  { %v1052_v57 = vpop.f32.mrf.mxu1 }
 0x340   :  { %v1053_v30 = vadd.f32 %v1052_v57, %v994_v13 }
 0x342   :  { %v2299_v45 = vmax.f32 %v1053_v30, 0.0 }
 0x344   :  { %v1094_v4 = vmul.f32 %v2299_v45, %v2299_v45 }
 0x347   :  { %v1054_v38 = vpop.f32.mrf.mxu1 }
 0x348   :  { %v1055_v62 = vadd.f32 %v1054_v38, %v994_v13 }
 0x34a   :  { %v2297_v43 = vmax.f32 %v1055_v62, 0.0  ;;  %v734_v62 = vpop.f32.mrf.mxu3 }
 0x34c   :  { %v1095_v49 = vmul.f32 %v2297_v43, %v2297_v43  ;;  %v1080_v52 = vadd.f32 %v2297_v43, %v2299_v45 }
 0x34e   :  { %v1102_v5 = vadd.f32 %v1095_v49, %v1094_v4 }
 0x34f   :  { %v1057_v47 = vpop.f32.mrf.mxu1 }
 0x350   :  { %v1058_v42 = vadd.f32 %v1057_v47, %v994_v13 }
 0x352   :  { %v2301_v46 = vmax.f32 %v1058_v42, 0.0 }
 0x354   :  { %v1096_v54 = vmul.f32 %v2301_v46, %v2301_v46  ;;  %v1081_v37 = vadd.f32 %v1080_v52, %v2301_v46 }
 0x356   :  { %v1103_v14 = vadd.f32 %v1102_v5, %v1096_v54 }
 0x357   :  { %v1059_v63 = vpop.f32.mrf.mxu1 }
 0x358   :  { %v1060_v44 = vadd.f32 %v1059_v63, %v994_v13 }
 0x35a   :  { %v2307_v50 = vmax.f32 %v1060_v44, 0.0 }
 0x35c   :  { %v1097_v21 = vmul.f32 %v2307_v50, %v2307_v50  ;;  %v1082_v56 = vadd.f32 %v1081_v37, %v2307_v50 }
 0x35e   :  { %v1104_v60 = vadd.f32 %v1103_v14, %v1097_v21 }
 0x35f   :  { %v1062_v40 = vpop.f32.mrf.mxu1 }
 0x360   :  { %v1063_v48 = vadd.f32 %v1062_v40, %v994_v13 }
 0x362   :  { %v2315_v8 = vmax.f32 %v1063_v48, 0.0  ;;  %v778_v48 = vpop.f32.mrf.mxu2 }
 0x364   :  { %v1098_v58 = vmul.f32 %v2315_v8, %v2315_v8  ;;  %v1083_v61 = vadd.f32 %v1082_v56, %v2315_v8 }
 0x366   :  { %v1105_v15 = vadd.f32 %v1104_v60, %v1098_v58 }
 0x367   :  { %v1064_v41 = vpop.f32.mrf.mxu1 }
 0x368   :  { %v1065_v20 = vadd.f32 %v1064_v41, %v994_v13 }
 0x36a   :  { %v2320_v22 = vmax.f32 %v1065_v20, 0.0 }
 0x36c   :  { %v1099_v33 = vmul.f32 %v2320_v22, %v2320_v22  ;;  %v1084_v3 = vadd.f32 %v1083_v61, %v2320_v22 }
 0x36e   :  { %v1106_v19 = vadd.f32 %v1105_v15, %v1099_v33 }
 0x36f   :  { %v1067_v24 = vpop.f32.mrf.mxu1 }
 0x370   :  { %v1068_v10 = vadd.f32 %v1067_v24, %v994_v13  ;;  %v737_v24 = vpop.f32.mrf.mxu3 }
 0x372   :  { %v2325_v59 = vmax.f32 %v1068_v10, 0.0  ;;  %v781_v10 = vpop.f32.mrf.mxu2 }
 0x374   :  { %v1100_v17 = vmul.f32 %v2325_v59, %v2325_v59  ;;  %v1085_v53 = vadd.f32 %v1084_v3, %v2325_v59 }
 0x376   :  { %v1107_v25 = vadd.f32 %v1106_v19, %v1100_v17 }
 0x377   :  { %v1069_v1 = vpop.f32.mrf.mxu1 }
 0x378   :  { %v1070_v16 = vadd.f32 %v1069_v1, %v994_v13  ;;  %v740_v37 = vpop.f32.mrf.mxu3 }
 0x37a   :  { %v2336_v29 = vmax.f32 %v1070_v16, 0.0  ;;  %v784_v58 = vpop.f32.mrf.mxu2 }
 0x37c   :  { %v1086_v26 = vadd.f32 %v1085_v53, %v2336_v29  ;;  %v1101_v27 = vmul.f32 %v2336_v29, %v2336_v29  ;;  %v729_v53 = vadd.f32 %v728_v9, %v2280_v36 }
 0x37e   :  { %v1087_v34 = vrot.slane %v1086_v26, 4  ;;  %v1108_v55 = vadd.f32 %v1107_v25, %v1101_v27  ;;  %v732_v25 = vadd.f32 %v731_v23, %v2282_v31  ;;  %v735_v27 = vadd.f32 %v734_v62, %v2284_v28 }
 0x380   :  { %v1088_v6 = vadd.f32 %v1087_v34, %v1086_v26  ;;  %v1109_v32 = vrot.slane %v1108_v55, 4  ;;  %v743_v61 = vpop.f32.mrf.mxu3  ;;  %v738_v34 = vadd.f32 %v737_v24, %v2286_v2  ;;  %v776_v2 = vadd.f32 %v775_v35, %v735_v27 }
 0x382   :  { %v1089_v57 = vrot.slane %v1088_v6, 2  ;;  %v1110_v38 = vadd.f32 %v1109_v32, %v1108_v55  ;;  %v787_v16 = vpop.f32.mrf.mxu2  ;;  %v741_v55 = vadd.f32 %v740_v37, %v2288_v11  ;;  %v744_v32 = vadd.f32 %v743_v61, %v2290_v7 }
 0x383   :  { %v779_v23 = vadd.f32 %v778_v48, %v738_v34 }
 0x384   :  { %v1090_v47 = vadd.f32 %v1089_v57, %v1088_v6  ;;  %v1111_v63 = vrot.slane %v1110_v38, 2  ;;  %v770_v57 = vadd.f32 %v2303_v0, %v729_v53 }
 0x386   :  { %v1091_v40 = vrot.slane %v1090_v47, 1  ;;  %v1112_v13 = vadd.f32 %v1111_v63, %v1110_v38  ;;  %v773_v38 = vadd.f32 %v2330_v12, %v732_v25  ;;  %v782_v12 = vadd.f32 %v781_v10, %v741_v55 }
 0x388   :  { %v1092_v30 = vadd.f32 %v1091_v40, %v1090_v47  ;;  %v1113_v41 = vrot.slane %v1112_v13, 1  ;;  %v746_v26 = vpop.f32.mrf.mxu3 }
 0x389   :  { %v747_v35 = vadd.f32 %v746_v26, %v2292_v39 }
 0x38a   :  { %v1093_v42 = vmul.f32 0.015625, %v1092_v30  ;;  %v1114_v44 = vadd.f32 %v1113_v41, %v1112_v13  ;;  %v790_v48 = vpop.f32.mrf.mxu2 }
 0x38c   :  { %v1115_v49 = vmul.f32 0.015625, %v1114_v44  ;;  %v1116_v20 = vmul.f32 %v1093_v42, %v1093_v42 }
 0x38e   :  { %v1117_v4 = vsub.f32 %v1115_v49, %v1116_v20 }
 0x390   :  { %v1118_v52 = vmax.f32 %v1117_v4, 0.0 }
 0x392   :  { %v1119_v54 = vadd.f32 1e-05, %v1118_v52  ;;  %v788_v52 = vadd.f32 %v787_v16, %v747_v35 }
 0x394   :  { %1460 = vrsqrt.f32 %v1119_v54  ;;  %vm1126_vm1 = vweird.f32 %v1119_v54 }
 0x39a   :  { %v1461_v5 = vpop.eup %1460 }
 0x39b   :  { %v1121_v21 = vmul.f32 %v1461_v5, %v1119_v54  ;;  %vm1127_vm13 = vweird.f32 %v1461_v5 }
 0x39c   :  { %vm1128_vm15 = vmor %vm1126_vm1, %vm1127_vm13 }
 0x39d   :  { %v1122_v14 = vmul.f32 %v1461_v5, %v1121_v21 }
 0x39f   :  { %v1123_v56 = vmul.f32 0.5, %v1122_v14 }
 0x3a1   :  { %v1124_v60 = vsub.f32 1.5, %v1123_v56 }
 0x3a3   :  { %v1125_v33 = vmul.f32 %v1461_v5, %v1124_v60 }
 0x3a5   :  { %v1129_v1 = vsel %vm1128_vm15, %v1461_v5, %v1125_v33 }
 0x3a6   :  { %v1130_v15 = vmul.f32 %v1129_v1, %v2208_v51 }
 0x3a8   :  { %v1131_v3 = vmul.f32 %v1130_v15, %v1093_v42  ;;  %v1136_v17 = vperm.slane %v1130_v15, 4  ;;  %v785_v42 = vadd.f32 %v784_v58, %v744_v32 }
 0x3aa   :  { %v1133_v19 = vrot.slane %v1131_v3, 7  ;;  %v1137_v47 = vmul.f32 %v1136_v17, %v2299_v45  ;;  %v1138_v36 = vmul.f32 %v1136_v17, %v2297_v43  ;;  %v1139_v31 = vmul.f32 %v1136_v17, %v2301_v46 }
 0x3ab   :  { %v1140_v28 = vmul.f32 %v1136_v17, %v2307_v50  ;;  %v1141_v11 = vmul.f32 %v1136_v17, %v2315_v8  ;;  %v1142_v63 = vmul.f32 %v1136_v17, %v2320_v22  ;;  %v1143_v45 = vmul.f32 %v1136_v17, %v2325_v59  ;;  %v749_v22 = vpop.f32.mrf.mxu3 }
 0x3ac   :  { %v1135_v6 = vsub.f32 %v2208_v51, %v1133_v19  ;;  %v1144_v8 = vmul.f32 %v1136_v17, %v2336_v29  ;;  %v750_v24 = vadd.f32 %v749_v22, %v2295_v18 }
 0x3ae   :  { %v1145_v9 = vperm.slane %v1135_v6, 5  ;;  %v791_v21 = vadd.f32 %v790_v48, %v750_v24 }
 0x3b0   :  { %v1146_v7 = vadd.f32 %v1145_v9, %v1137_v47  ;;  %v1147_v40 = vadd.f32 %v1145_v9, %v1138_v36  ;;  %v1148_v0 = vadd.f32 %v1145_v9, %v1139_v31  ;;  %v1149_v13 = vadd.f32 %v1145_v9, %v1140_v28 }
 0x3b1   :  { %v1150_v62 = vadd.f32 %v1145_v9, %v1141_v11  ;;  %v1151_v43 = vadd.f32 %v1145_v9, %v1142_v63  ;;  %v1152_v44 = vadd.f32 %v1145_v9, %v1143_v45  ;;  %v1153_v54 = vadd.f32 %v1145_v9, %v1144_v8 }
 0x3b2   :  { %v1154_v30 = vadd.f32 %v1146_v7, %v770_v57  ;;  %v1155_v46 = vadd.f32 %v1147_v40, %v773_v38  ;;  %v1156_v41 = vadd.f32 %v1148_v0, %v776_v2  ;;  %v1157_v50 = vadd.f32 %v1149_v13, %v779_v23 }
 0x3b3   :  { %v1158_v49 = vadd.f32 %v1150_v62, %v782_v12  ;;  %v1159_v10 = vadd.f32 %v1151_v43, %v785_v42  ;;  %v1160_v14 = vadd.f32 %v1152_v44, %v788_v52  ;;  %v1161_v61 = vadd.f32 %v1153_v54, %v791_v21 }
 0x3b4   :  { %v2360_v20 = vmax.f32 %v1154_v30, 0.0  ;;  %v2362_v4 = vmax.f32 %v1155_v46, 0.0  ;;  %v2364_v59 = vmax.f32 %v1156_v41, 0.0  ;;  %v2367_v5 = vmax.f32 %v1157_v50, 0.0 }
 0x3b5   :  { %v1166_v56 = vmax.f32 %v1158_v49, 0.0  ;;  %v1167_v33 = vmax.f32 %v1159_v10, 0.0  ;;  %v1168_v17 = vmax.f32 %v1160_v14, 0.0  ;;  %v1169_v25 = vmax.f32 %v1161_v61, 0.0 }
 0x3b6   :  { %v1170_v39 = vadd.f32 %v2362_v4, %v2360_v20  ;;  %v1184_v29 = vmul.f32 %v2360_v20, %v2360_v20  ;;  %v1185_v37 = vmul.f32 %v2362_v4, %v2362_v4  ;;  %v1186_v18 = vmul.f32 %v2364_v59, %v2364_v59 }
 0x3b7   :  { %v1187_v15 = vmul.f32 %v2367_v5, %v2367_v5  ;;  %v1188_v19 = vmul.f32 %v1166_v56, %v1166_v56  ;;  %v1189_v27 = vmul.f32 %v1167_v33, %v1167_v33  ;;  %v1190_v6 = vmul.f32 %v1168_v17, %v1168_v17 }
 0x3b8   :  { %v1171_v58 = vadd.f32 %v1170_v39, %v2364_v59  ;;  %v1192_v60 = vadd.f32 %v1185_v37, %v1184_v29  ;;  %v1191_v38 = vmul.f32 %v1169_v25, %v1169_v25 }
 0x3ba   :  { %v1172_v1 = vadd.f32 %v1171_v58, %v2367_v5  ;;  %v1193_v3 = vadd.f32 %v1192_v60, %v1186_v18 }
 0x3bc   :  { %v1173_v16 = vadd.f32 %v1172_v1, %v1166_v56  ;;  %v1194_v53 = vadd.f32 %v1193_v3, %v1187_v15 }
 0x3be   :  { %v1174_v26 = vadd.f32 %v1173_v16, %v1167_v33  ;;  %v1195_v34 = vadd.f32 %v1194_v53, %v1188_v19 }
 0x3c0   :  { %v1175_v55 = vadd.f32 %v1174_v26, %v1168_v17  ;;  %v1196_v32 = vadd.f32 %v1195_v34, %v1189_v27 }
 0x3c2   :  { %v1176_v57 = vadd.f32 %v1175_v55, %v1169_v25  ;;  %v1197_v47 = vadd.f32 %v1196_v32, %v1190_v6 }
 0x3c4   :  { %v1177_v36 = vrot.slane %v1176_v57, 4  ;;  %v1198_v31 = vadd.f32 %v1197_v47, %v1191_v38 }
 0x3c6   :  { %v1178_v28 = vadd.f32 %v1177_v36, %v1176_v57  ;;  %v1199_v9 = vrot.slane %v1198_v31, 4 }
 0x3c8   :  { %v1179_v2 = vrot.slane %v1178_v28, 2  ;;  %v1200_v23 = vadd.f32 %v1199_v9, %v1198_v31 }
 0x3ca   :  { %v1180_v11 = vadd.f32 %v1179_v2, %v1178_v28  ;;  %v1201_v63 = vrot.slane %v1200_v23, 2 }
 0x3cc   :  { %v1181_v7 = vrot.slane %v1180_v11, 1  ;;  %v1202_v40 = vadd.f32 %v1201_v63, %v1200_v23 }
 0x3ce   :  { %v1182_v0 = vadd.f32 %v1181_v7, %v1180_v11  ;;  %v1203_v13 = vrot.slane %v1202_v40, 1 }
 0x3d0   :  { %v1183_v12 = vmul.f32 0.015625, %v1182_v0  ;;  %v1204_v45 = vadd.f32 %v1203_v13, %v1202_v40 }
 0x3d2   :  { %v1205_v62 = vmul.f32 0.015625, %v1204_v45  ;;  %v1206_v43 = vmul.f32 %v1183_v12, %v1183_v12 }
 0x3d4   :  { %v1207_v30 = vsub.f32 %v1205_v62, %v1206_v43 }
 0x3d6   :  { %v1208_v46 = vmax.f32 %v1207_v30, 0.0 }
 0x3d8   :  { %v1209_v41 = vadd.f32 1e-05, %v1208_v46 }
 0x3da   :  { %1462 = vrsqrt.f32 %v1209_v41  ;;  %vm1216_vm2 = vweird.f32 %v1209_v41 }
 0x3e0   :  { %v1463_v50 = vpop.eup %1462 }
 0x3e1   :  { %v1211_v35 = vmul.f32 %v1463_v50, %v1209_v41  ;;  %vm1217_vm0 = vweird.f32 %v1463_v50 }
 0x3e2   :  { %vm1218_vm14 = vmor %vm1216_vm2, %vm1217_vm0 }
 0x3e3   :  { %v1212_v42 = vmul.f32 %v1463_v50, %v1211_v35 }
 0x3e5   :  { %v1213_v8 = vmul.f32 0.5, %v1212_v42 }
 0x3e7   :  { %v1214_v44 = vsub.f32 1.5, %v1213_v8 }
 0x3e9   :  { %v1215_v22 = vmul.f32 %v1463_v50, %v1214_v44 }
 0x3eb   :  { %v1219_v48 = vsel %vm1218_vm14, %v1463_v50, %v1215_v22 }
 0x3ec   :  { %v1220_v49 = vmul.f32 %v1219_v48, %v2208_v51 }
 0x3ee   :  { %v1221_v24 = vmul.f32 %v1220_v49, %v1183_v12  ;;  %v1226_v52 = vperm.slane %v1220_v49, 6 }
 0x3f0   :  { %v1223_v54 = vrot.slane %v1221_v24, 7  ;;  %v1227_v10 = vmul.f32 %v1226_v52, %v2360_v20  ;;  %v1228_v39 = vmul.f32 %v1226_v52, %v2362_v4  ;;  %v1229_v29 = vmul.f32 %v1226_v52, %v2364_v59 }
 0x3f1   :  { %v1230_v37 = vmul.f32 %v1226_v52, %v2367_v5  ;;  %v1231_v21 = vmul.f32 %v1226_v52, %v1166_v56  ;;  %v1232_v14 = vmul.f32 %v1226_v52, %v1167_v33  ;;  %v1233_v58 = vmul.f32 %v1226_v52, %v1168_v17 }
 0x3f2   :  { %v1225_v18 = vsub.f32 %v2208_v51, %v1223_v54  ;;  %v1234_v61 = vmul.f32 %v1226_v52, %v1169_v25 }
 0x3f4   :  { %v1235_v60 = vperm.slane %v1225_v18, 7 }
 0x3f6   :  { %v1236_v1 = vadd.f32 %v1235_v60, %v1227_v10  ;;  %v1237_v15 = vadd.f32 %v1235_v60, %v1228_v39  ;;  %v1238_v3 = vadd.f32 %v1235_v60, %v1229_v29  ;;  %v1239_v16 = vadd.f32 %v1235_v60, %v1230_v37 }
 0x3f7   :  { %v1240_v19 = vadd.f32 %v1235_v60, %v1231_v21  ;;  %v1241_v53 = vadd.f32 %v1235_v60, %v1232_v14  ;;  %v1242_v20 = vadd.f32 %v1235_v60, %v1233_v58  ;;  %v1243_v26 = vadd.f32 %v1235_v60, %v1234_v61 }
 0x3f8   :  { %1244 = vst [vmem:[#allocation2] sm:$0xff] %v1236_v1 }
 0x3f9   :  { %1245 = vst [vmem:[#allocation2 + $0x8] sm:$0xff] %v1237_v15 }
 0x3fa   :  { %1246 = vst [vmem:[#allocation2 + $0x10] sm:$0xff] %v1238_v3 }
 0x3fb   :  { %1247 = vst [vmem:[#allocation2 + $0x18] sm:$0xff] %v1239_v16 }
 0x3fc   :  { %1248 = vst [vmem:[#allocation2 + $0x20] sm:$0xff] %v1240_v19 }
 0x3fd   :  { %1249 = vst [vmem:[#allocation2 + $0x28] sm:$0xff] %v1241_v53 }
 0x3fe   :  { %1250 = vst [vmem:[#allocation2 + $0x30] sm:$0xff] %v1242_v20 }
 0x3ff   :  { %1251 = vst [vmem:[#allocation2 + $0x38] sm:$0xff] %v1243_v26 }
 0x400   :  { %1264 = dma.vmem_to_hbm [thread:$0]  %s1257_s21, 1024, %s1259_s24, [#allocation3], %s1497_s25, %s1497_s25, %s1498_s26  }
 0x401   :  { %1488 = dma.done.wait [#allocation3], 1024  }
 0x402   :  { %1489 = vsyncadd [#allocation3], 4294966272 }
 0x403   :  { %1269 = vsyncpa [#allocation3], 1 }

</bundles_post_ra>
